<compile_context>
chip_gen: v7x
topology: tpu7x:2x2x1
jax: 0.10.0
libtpu: 0.0.40
codegen_flags: <defaults>
</compile_context>

<pallas_src>
import numpy as np

import jax
import jax.numpy as jnp
from jax import lax
from jax.experimental import pallas as pl
from jax.experimental.pallas import tpu as pltpu

DIM_MODEL = 32
HEADS = 4
HEAD_DIM = DIM_MODEL // HEADS
SEQ_LEN = 8
BATCH = 2
LN_EPS = 1e-5   # PyTorch nn.LayerNorm default

# Row layout of the packed (16, D) bias / LayerNorm-vector matrix.
V_ORDER = ("bq1", "bk1", "bv1", "bo1", "bq2", "bk2", "bv2", "bo2", "b1f", "b2f",
           "g1", "b1", "g2", "b2", "g3", "b3")
VI = {k: i for i, k in enumerate(V_ORDER)}


# ---------------- shared math ---------------------------------------------------

def _layer_norm(x, g, b):
    mu = jnp.mean(x, axis=-1, keepdims=True)
    var = jnp.mean((x - mu) ** 2, axis=-1, keepdims=True)
    return (x - mu) * jax.lax.rsqrt(var + LN_EPS) * g + b


# ---------------- Pallas kernel --------------------------------------------------

def decoder_block_kernel(x_ref, e_ref, wqkv1_ref, wo1_ref, wq2_ref, wkv2_ref,
                         wo2_ref, w1f_ref, w2f_ref, vec_ref, bias_ref, o_ref):
    D, HD, H = DIM_MODEL, HEAD_DIM, HEADS
    x = x_ref[...]                 # (B*n, D)
    enc = e_ref[...]               # (B*n, D)
    vec = vec_ref[...]             # (16, D)  packed bias / LN vectors
    bias = bias_ref[...]           # (B*n, B*n) block-diagonal causal additive bias
    scale = 1.0 / (HD ** 0.5)

    def vrow(name):                # (1, D) vector from the packed matrix
        i = VI[name]
        return vec[i:i + 1, :]

    def attention(q, k, v, wo, bo):
        """q,k,v: (B*n, D) with heads laid out along columns.

        Batch separation is done by the block-diagonal mask, so the score /
        PV / output-projection matmuls operate on flat 2-D operands - no
        per-batch loop, no 4-D reshapes, no interleave transpose.
        """
        acc = None
        for h in range(H):                        # static 4-iteration head loop
            sl = slice(h * HD, (h + 1) * HD)
            # scores: (B*n, B*n), contracting the head_dim columns of q and k
            s = lax.dot_general(q[:, sl], k[:, sl],
                                (((1,), (1,)), ((), ())),
                                preferred_element_type=jnp.float32)
            s = s * scale + bias
            s = s - jnp.max(s, axis=-1, keepdims=True)
            e = jnp.exp(s)
            p = e / jnp.sum(e, axis=-1, keepdims=True)      # exact softmax
            ctx = jnp.dot(p, v[:, sl], preferred_element_type=jnp.float32)  # (B*n, HD)
            part = jnp.dot(ctx, wo[sl, :], preferred_element_type=jnp.float32)
            acc = part if acc is None else acc + part
        return acc + bo

    # --- M1 = LN1(x) + SelfAttention(LN1(x)) (causal) ----------------------------
    x1 = _layer_norm(x, vrow("g1"), vrow("b1"))
    qkv = jnp.dot(x1, wqkv1_ref[...], preferred_element_type=jnp.float32)   # (B*n, 3D)
    q1 = qkv[:, 0 * D:1 * D] + vrow("bq1")
    k1 = qkv[:, 1 * D:2 * D] + vrow("bk1")
    v1 = qkv[:, 2 * D:3 * D] + vrow("bv1")
    m1 = x1 + attention(q1, k1, v1, wo1_ref[...], vrow("bo1"))

    # --- M2 = M1 + CrossAttention(M1, LN2(enc), LN2(enc)) (causal) ---------------
    e1 = _layer_norm(enc, vrow("g2"), vrow("b2"))
    q2 = jnp.dot(m1, wq2_ref[...], preferred_element_type=jnp.float32) + vrow("bq2")
    kv2 = jnp.dot(e1, wkv2_ref[...], preferred_element_type=jnp.float32)    # (B*n, 2D)
    k2 = kv2[:, 0 * D:1 * D] + vrow("bk2")
    v2 = kv2[:, 1 * D:2 * D] + vrow("bv2")
    m2 = m1 + attention(q2, k2, v2, wo2_ref[...], vrow("bo2"))

    # --- y = LN3(M2) + FFN(LN3(M2)) -----------------------------------------------
    x3 = _layer_norm(m2, vrow("g3"), vrow("b3"))
    hdn = jnp.maximum(
        jnp.dot(x3, w1f_ref[...], preferred_element_type=jnp.float32) + vrow("b1f"),
        0.0)
    ffn = jnp.dot(hdn, w2f_ref[...], preferred_element_type=jnp.float32) + vrow("b2f")
    o_ref[...] = x3 + ffn          # (B*n, D)


# ---------------- one-time parameter packing (init-time, not per-call) ----------

def _build_causal_bias(batch, n):
    """Block-diagonal causal additive bias over flattened (batch*n) tokens."""
    m = np.full((batch * n, batch * n), -1e9, dtype=np.float32)
    for b in range(batch):
        for i in range(n):
            m[b * n + i, b * n: b * n + i + 1] = 0.0   # attend to self + past, own batch
    return m


def pack_params(params, batch=BATCH, seq_len=SEQ_LEN):
    """Pack raw per-layer weights into fused, lane-contiguous kernel operands.

    Called once at model init (NOT per forward call)."""
    D = DIM_MODEL
    wqkv1 = jnp.concatenate([params["wq1"], params["wk1"], params["wv1"]], axis=1)  # (D, 3D)
    wkv2 = jnp.concatenate([params["wk2"], params["wv2"]], axis=1)                  # (D, 2D)
    vec = jnp.concatenate([params[k].reshape(1, D) for k in V_ORDER], axis=0)       # (16, D)
    bias = jnp.asarray(_build_causal_bias(batch, seq_len))                          # (B*n, B*n)
    return dict(wqkv1=wqkv1, wo1=params["wo1"], wq2=params["wq2"], wkv2=wkv2,
                wo2=params["wo2"], w1f=params["w1f"], w2f=params["w2f"],
                vec=vec, bias=bias)


# ---------------- wrapper ---------------------------------------------------------

def decoder_block_pallas(out, en_out, packed):
    B, n, D = out.shape
    x2d = out.reshape(B * n, D)        # contiguous reshape, no data movement
    e2d = en_out.reshape(B * n, D)
    vmem = pl.BlockSpec(memory_space=pltpu.MemorySpace.VMEM)

    y2d = pl.pallas_call(
        decoder_block_kernel,
        out_shape=jax.ShapeDtypeStruct((B * n, D), jnp.float32),
        in_specs=[vmem] * 11,
        out_specs=vmem,
    )(x2d, e2d,
      packed["wqkv1"], packed["wo1"], packed["wq2"], packed["wkv2"],
      packed["wo2"], packed["w1f"], packed["w2f"], packed["vec"], packed["bias"])
    return y2d.reshape(B, n, D)


# ---------------- pure-JAX reference (HIGHEST-precision f32 matmuls) ------------

_HI = jax.lax.Precision.HIGHEST


def _ref_mha(q_in, kv_in, wq, bq, wk, bk, wv, bv, wo, bo, allow):
    n = q_in.shape[0]
    q = jnp.dot(q_in, wq, precision=_HI) + bq
    k = jnp.dot(kv_in, wk, precision=_HI) + bk
    v = jnp.dot(kv_in, wv, precision=_HI) + bv
    qh = q.reshape(n, HEADS, HEAD_DIM)
    kh = k.reshape(-1, HEADS, HEAD_DIM)
    vh = v.reshape(-1, HEADS, HEAD_DIM)
    s = jnp.einsum('nhd,mhd->hnm', qh, kh, precision=_HI) / (HEAD_DIM ** 0.5)
    s = jnp.where(allow, s, -1e9)
    p = jax.nn.softmax(s, axis=-1)
    ctx = jnp.einsum('hnm,mhd->nhd', p, vh, precision=_HI).reshape(n, DIM_MODEL)
    return jnp.dot(ctx, wo, precision=_HI) + bo


def _ref_block(x, enc, p, allow):
    x1 = _layer_norm(x, p["g1"], p["b1"])
    m1 = x1 + _ref_mha(x1, x1, p["wq1"], p["bq1"], p["wk1"], p["bk1"],
                       p["wv1"], p["bv1"], p["wo1"], p["bo1"], allow)
    e1 = _layer_norm(enc, p["g2"], p["b2"])
    m2 = m1 + _ref_mha(m1, e1, p["wq2"], p["bq2"], p["wk2"], p["bk2"],
                       p["wv2"], p["bv2"], p["wo2"], p["bo2"], allow)
    x3 = _layer_norm(m2, p["g3"], p["b3"])
    h = jnp.maximum(jnp.dot(x3, p["w1f"], precision=_HI) + p["b1f"], 0.0)
    f = jnp.dot(h, p["w2f"], precision=_HI) + p["b2f"]
    return x3 + f


# ---------------- deterministic synthetic parameters ----------------------------

def init_params(key):
    D = DIM_MODEL
    params = {}
    w_names = ["wq1", "wk1", "wv1", "wo1", "wq2", "wk2", "wv2", "wo2", "w1f", "w2f"]
    b_names = ["bq1", "bk1", "bv1", "bo1", "bq2", "bk2", "bv2", "bo2", "b1f", "b2f"]
    keys = jax.random.split(key, len(w_names) + len(b_names))
    for i, nm in enumerate(w_names):
        params[nm] = jax.random.normal(keys[i], (D, D), jnp.float32) * (1.0 / (D ** 0.5))
    for j, nm in enumerate(b_names):
        params[nm] = jax.random.normal(keys[len(w_names) + j], (1, D), jnp.float32) * 0.02
    for nm in ("g1", "g2", "g3"):
        params[nm] = jnp.ones((1, D), jnp.float32)
    for nm in ("b1", "b2", "b3"):
        params[nm] = jnp.zeros((1, D), jnp.float32)
    return params


if __name__ == "__main__":
    # TODO(synk): train-mode dropout and the rotary!='none' / diff!=None attention
    # paths of the original module are not exercised (eval-mode, rotary='none').
    key = jax.random.PRNGKey(0)
    k_out, k_en, k_p = jax.random.split(key, 3)
    out = jax.random.normal(k_out, (BATCH, SEQ_LEN, DIM_MODEL), jnp.float32)
    en_out = jax.random.normal(k_en, (BATCH, SEQ_LEN, DIM_MODEL), jnp.float32)
    params = init_params(k_p)
    packed = pack_params(params)           # one-time (init-time) packing

    y = decoder_block_pallas(out, en_out, packed)
    y = jax.block_until_ready(y)

    # reference check (vmapped over batch, per-batch causal mask)
    allow = jnp.asarray(np.tril(np.ones((SEQ_LEN, SEQ_LEN), dtype=bool)))
    ref = jax.vmap(lambda x, e: _ref_block(x, e, params, allow))(out, en_out)
    err = float(jnp.max(jnp.abs(y - ref)))
    # Exact-division softmax: remaining tolerance only covers MXU f32-pass vs
    # XLA HIGHEST-precision matmul differences across the residual chain.
    assert err < 5e-3, f"max abs error {err}"
    print("KERNEL_OK")
</pallas_src>

<mosaic_0001>
module attributes {stable_mosaic.version = 11 : i64} {
  func.func @decoder_block_kernel(%arg0: memref<16x32xf32, #tpu.memory_space<vmem>>, %arg1: memref<16x32xf32, #tpu.memory_space<vmem>>, %arg2: memref<32x96xf32, #tpu.memory_space<vmem>>, %arg3: memref<32x32xf32, #tpu.memory_space<vmem>>, %arg4: memref<32x32xf32, #tpu.memory_space<vmem>>, %arg5: memref<32x64xf32, #tpu.memory_space<vmem>>, %arg6: memref<32x32xf32, #tpu.memory_space<vmem>>, %arg7: memref<32x32xf32, #tpu.memory_space<vmem>>, %arg8: memref<32x32xf32, #tpu.memory_space<vmem>>, %arg9: memref<16x32xf32, #tpu.memory_space<vmem>>, %arg10: memref<16x16xf32, #tpu.memory_space<vmem>>, %arg11: memref<16x32xf32, #tpu.memory_space<vmem>>) attributes {dimension_semantics = [], scalar_prefetch = 0 : i64, scratch_operands = 0 : i64, tpu.core_type = #tpu.core_type<tc>} {
    %c0 = arith.constant 0 : index
    %c0_0 = arith.constant 0 : index
    %0 = vector.load %arg0[%c0, %c0_0] : memref<16x32xf32, #tpu.memory_space<vmem>>, vector<16x32xf32>
    %c0_1 = arith.constant 0 : index
    %c0_2 = arith.constant 0 : index
    %1 = vector.load %arg1[%c0_1, %c0_2] : memref<16x32xf32, #tpu.memory_space<vmem>>, vector<16x32xf32>
    %c0_3 = arith.constant 0 : index
    %c0_4 = arith.constant 0 : index
    %2 = vector.load %arg9[%c0_3, %c0_4] : memref<16x32xf32, #tpu.memory_space<vmem>>, vector<16x32xf32>
    %c0_5 = arith.constant 0 : index
    %c0_6 = arith.constant 0 : index
    %3 = vector.load %arg10[%c0_5, %c0_6] : memref<16x16xf32, #tpu.memory_space<vmem>>, vector<16x16xf32>
    %4 = vector.extract_strided_slice %2 {offsets = [10, 0], sizes = [1, 32], strides = [1, 1]} : vector<16x32xf32> to vector<1x32xf32>
    %5 = vector.extract_strided_slice %2 {offsets = [11, 0], sizes = [1, 32], strides = [1, 1]} : vector<16x32xf32> to vector<1x32xf32>
    %cst = arith.constant dense<0.000000e+00> : vector<16xf32>
    %6 = vector.multi_reduction <add>, %0, %cst [1] : vector<16x32xf32> to vector<16xf32>
    %7 = vector.shape_cast %6 : vector<16xf32> to vector<16x1xf32>
    %cst_7 = arith.constant 3.200000e+01 : f32
    %8 = vector.broadcast %cst_7 : f32 to vector<16x1xf32>
    %9 = arith.divf %7, %8 : vector<16x1xf32>
    %10 = vector.broadcast %9 : vector<16x1xf32> to vector<16x32xf32>
    %11 = arith.subf %0, %10 : vector<16x32xf32>
    %12 = arith.mulf %11, %11 : vector<16x32xf32>
    %cst_8 = arith.constant dense<0.000000e+00> : vector<16xf32>
    %13 = vector.multi_reduction <add>, %12, %cst_8 [1] : vector<16x32xf32> to vector<16xf32>
    %14 = vector.shape_cast %13 : vector<16xf32> to vector<16x1xf32>
    %cst_9 = arith.constant 3.200000e+01 : f32
    %15 = vector.broadcast %cst_9 : f32 to vector<16x1xf32>
    %16 = arith.divf %14, %15 : vector<16x1xf32>
    %17 = vector.broadcast %9 : vector<16x1xf32> to vector<16x32xf32>
    %18 = arith.subf %0, %17 : vector<16x32xf32>
    %cst_10 = arith.constant 9.99999974E-6 : f32
    %19 = vector.broadcast %cst_10 : f32 to vector<16x1xf32>
    %20 = arith.addf %16, %19 : vector<16x1xf32>
    %21 = math.rsqrt %20 : vector<16x1xf32>
    %22 = vector.broadcast %21 : vector<16x1xf32> to vector<16x32xf32>
    %23 = arith.mulf %18, %22 : vector<16x32xf32>
    %24 = vector.broadcast %4 : vector<1x32xf32> to vector<16x32xf32>
    %25 = arith.mulf %23, %24 : vector<16x32xf32>
    %26 = vector.broadcast %5 : vector<1x32xf32> to vector<16x32xf32>
    %27 = arith.addf %25, %26 : vector<16x32xf32>
    %c0_11 = arith.constant 0 : index
    %c0_12 = arith.constant 0 : index
    %28 = vector.load %arg2[%c0_11, %c0_12] : memref<32x96xf32, #tpu.memory_space<vmem>>, vector<32x96xf32>
    %cst_13 = arith.constant dense<0.000000e+00> : vector<16x96xf32>
    %29 = tpu.matmul %27, %28, %cst_13 {dimension_numbers = #tpu.dot_dimension_numbers<[1], [0], [0], [1], [0, 0, 1, 1], [], []>} : vector<16x32xf32>, vector<32x96xf32>, vector<16x96xf32> -> vector<16x96xf32>
    %30 = vector.extract_strided_slice %29 {offsets = [0, 0], sizes = [16, 32], strides = [1, 1]} : vector<16x96xf32> to vector<16x32xf32>
    %31 = vector.extract_strided_slice %2 {offsets = [0, 0], sizes = [1, 32], strides = [1, 1]} : vector<16x32xf32> to vector<1x32xf32>
    %32 = vector.broadcast %31 : vector<1x32xf32> to vector<16x32xf32>
    %33 = arith.addf %30, %32 : vector<16x32xf32>
    %34 = vector.extract_strided_slice %29 {offsets = [0, 32], sizes = [16, 32], strides = [1, 1]} : vector<16x96xf32> to vector<16x32xf32>
    %35 = vector.extract_strided_slice %2 {offsets = [1, 0], sizes = [1, 32], strides = [1, 1]} : vector<16x32xf32> to vector<1x32xf32>
    %36 = vector.broadcast %35 : vector<1x32xf32> to vector<16x32xf32>
    %37 = arith.addf %34, %36 : vector<16x32xf32>
    %38 = vector.extract_strided_slice %29 {offsets = [0, 64], sizes = [16, 32], strides = [1, 1]} : vector<16x96xf32> to vector<16x32xf32>
    %39 = vector.extract_strided_slice %2 {offsets = [2, 0], sizes = [1, 32], strides = [1, 1]} : vector<16x32xf32> to vector<1x32xf32>
    %40 = vector.broadcast %39 : vector<1x32xf32> to vector<16x32xf32>
    %41 = arith.addf %38, %40 : vector<16x32xf32>
    %c0_14 = arith.constant 0 : index
    %c0_15 = arith.constant 0 : index
    %42 = vector.load %arg3[%c0_14, %c0_15] : memref<32x32xf32, #tpu.memory_space<vmem>>, vector<32x32xf32>
    %43 = vector.extract_strided_slice %2 {offsets = [3, 0], sizes = [1, 32], strides = [1, 1]} : vector<16x32xf32> to vector<1x32xf32>
    %44 = vector.extract_strided_slice %33 {offsets = [0, 0], sizes = [16, 8], strides = [1, 1]} : vector<16x32xf32> to vector<16x8xf32>
    %45 = vector.extract_strided_slice %37 {offsets = [0, 0], sizes = [16, 8], strides = [1, 1]} : vector<16x32xf32> to vector<16x8xf32>
    %cst_16 = arith.constant dense<0.000000e+00> : vector<16x16xf32>
    %46 = tpu.matmul %44, %45, %cst_16 {dimension_numbers = #tpu.dot_dimension_numbers<[1], [1], [0], [0], [0, 0, 1, 0], [], []>} : vector<16x8xf32>, vector<16x8xf32>, vector<16x16xf32> -> vector<16x16xf32>
    %cst_17 = arith.constant 0.353553385 : f32
    %47 = vector.broadcast %cst_17 : f32 to vector<16x16xf32>
    %48 = arith.mulf %46, %47 : vector<16x16xf32>
    %49 = arith.addf %48, %3 : vector<16x16xf32>
    %cst_18 = arith.constant dense<0xFF800000> : vector<16xf32>
    %50 = vector.multi_reduction <maximumf>, %49, %cst_18 [1] : vector<16x16xf32> to vector<16xf32>
    %51 = vector.shape_cast %50 : vector<16xf32> to vector<16x1xf32>
    %52 = vector.broadcast %51 : vector<16x1xf32> to vector<16x16xf32>
    %53 = arith.subf %49, %52 : vector<16x16xf32>
    %54 = math.exp %53 : vector<16x16xf32>
    %cst_19 = arith.constant dense<0.000000e+00> : vector<16xf32>
    %55 = vector.multi_reduction <add>, %54, %cst_19 [1] : vector<16x16xf32> to vector<16xf32>
    %56 = vector.shape_cast %55 : vector<16xf32> to vector<16x1xf32>
    %57 = vector.broadcast %56 : vector<16x1xf32> to vector<16x16xf32>
    %58 = arith.divf %54, %57 : vector<16x16xf32>
    %59 = vector.extract_strided_slice %41 {offsets = [0, 0], sizes = [16, 8], strides = [1, 1]} : vector<16x32xf32> to vector<16x8xf32>
    %cst_20 = arith.constant dense<0.000000e+00> : vector<16x8xf32>
    %60 = tpu.matmul %58, %59, %cst_20 {dimension_numbers = #tpu.dot_dimension_numbers<[1], [0], [0], [1], [0, 0, 1, 1], [], []>} : vector<16x16xf32>, vector<16x8xf32>, vector<16x8xf32> -> vector<16x8xf32>
    %61 = vector.extract_strided_slice %42 {offsets = [0, 0], sizes = [8, 32], strides = [1, 1]} : vector<32x32xf32> to vector<8x32xf32>
    %cst_21 = arith.constant dense<0.000000e+00> : vector<16x32xf32>
    %62 = tpu.matmul %60, %61, %cst_21 {dimension_numbers = #tpu.dot_dimension_numbers<[1], [0], [0], [1], [0, 0, 1, 1], [], []>} : vector<16x8xf32>, vector<8x32xf32>, vector<16x32xf32> -> vector<16x32xf32>
    %63 = vector.extract_strided_slice %33 {offsets = [0, 8], sizes = [16, 8], strides = [1, 1]} : vector<16x32xf32> to vector<16x8xf32>
    %64 = vector.extract_strided_slice %37 {offsets = [0, 8], sizes = [16, 8], strides = [1, 1]} : vector<16x32xf32> to vector<16x8xf32>
    %cst_22 = arith.constant dense<0.000000e+00> : vector<16x16xf32>
    %65 = tpu.matmul %63, %64, %cst_22 {dimension_numbers = #tpu.dot_dimension_numbers<[1], [1], [0], [0], [0, 0, 1, 0], [], []>} : vector<16x8xf32>, vector<16x8xf32>, vector<16x16xf32> -> vector<16x16xf32>
    %cst_23 = arith.constant 0.353553385 : f32
    %66 = vector.broadcast %cst_23 : f32 to vector<16x16xf32>
    %67 = arith.mulf %65, %66 : vector<16x16xf32>
    %68 = arith.addf %67, %3 : vector<16x16xf32>
    %cst_24 = arith.constant dense<0xFF800000> : vector<16xf32>
    %69 = vector.multi_reduction <maximumf>, %68, %cst_24 [1] : vector<16x16xf32> to vector<16xf32>
    %70 = vector.shape_cast %69 : vector<16xf32> to vector<16x1xf32>
    %71 = vector.broadcast %70 : vector<16x1xf32> to vector<16x16xf32>
    %72 = arith.subf %68, %71 : vector<16x16xf32>
    %73 = math.exp %72 : vector<16x16xf32>
    %cst_25 = arith.constant dense<0.000000e+00> : vector<16xf32>
    %74 = vector.multi_reduction <add>, %73, %cst_25 [1] : vector<16x16xf32> to vector<16xf32>
    %75 = vector.shape_cast %74 : vector<16xf32> to vector<16x1xf32>
    %76 = vector.broadcast %75 : vector<16x1xf32> to vector<16x16xf32>
    %77 = arith.divf %73, %76 : vector<16x16xf32>
    %78 = vector.extract_strided_slice %41 {offsets = [0, 8], sizes = [16, 8], strides = [1, 1]} : vector<16x32xf32> to vector<16x8xf32>
    %cst_26 = arith.constant dense<0.000000e+00> : vector<16x8xf32>
    %79 = tpu.matmul %77, %78, %cst_26 {dimension_numbers = #tpu.dot_dimension_numbers<[1], [0], [0], [1], [0, 0, 1, 1], [], []>} : vector<16x16xf32>, vector<16x8xf32>, vector<16x8xf32> -> vector<16x8xf32>
    %80 = vector.extract_strided_slice %42 {offsets = [8, 0], sizes = [8, 32], strides = [1, 1]} : vector<32x32xf32> to vector<8x32xf32>
    %cst_27 = arith.constant dense<0.000000e+00> : vector<16x32xf32>
    %81 = tpu.matmul %79, %80, %cst_27 {dimension_numbers = #tpu.dot_dimension_numbers<[1], [0], [0], [1], [0, 0, 1, 1], [], []>} : vector<16x8xf32>, vector<8x32xf32>, vector<16x32xf32> -> vector<16x32xf32>
    %82 = arith.addf %62, %81 : vector<16x32xf32>
    %83 = vector.extract_strided_slice %33 {offsets = [0, 16], sizes = [16, 8], strides = [1, 1]} : vector<16x32xf32> to vector<16x8xf32>
    %84 = vector.extract_strided_slice %37 {offsets = [0, 16], sizes = [16, 8], strides = [1, 1]} : vector<16x32xf32> to vector<16x8xf32>
    %cst_28 = arith.constant dense<0.000000e+00> : vector<16x16xf32>
    %85 = tpu.matmul %83, %84, %cst_28 {dimension_numbers = #tpu.dot_dimension_numbers<[1], [1], [0], [0], [0, 0, 1, 0], [], []>} : vector<16x8xf32>, vector<16x8xf32>, vector<16x16xf32> -> vector<16x16xf32>
    %cst_29 = arith.constant 0.353553385 : f32
    %86 = vector.broadcast %cst_29 : f32 to vector<16x16xf32>
    %87 = arith.mulf %85, %86 : vector<16x16xf32>
    %88 = arith.addf %87, %3 : vector<16x16xf32>
    %cst_30 = arith.constant dense<0xFF800000> : vector<16xf32>
    %89 = vector.multi_reduction <maximumf>, %88, %cst_30 [1] : vector<16x16xf32> to vector<16xf32>
    %90 = vector.shape_cast %89 : vector<16xf32> to vector<16x1xf32>
    %91 = vector.broadcast %90 : vector<16x1xf32> to vector<16x16xf32>
    %92 = arith.subf %88, %91 : vector<16x16xf32>
    %93 = math.exp %92 : vector<16x16xf32>
    %cst_31 = arith.constant dense<0.000000e+00> : vector<16xf32>
    %94 = vector.multi_reduction <add>, %93, %cst_31 [1] : vector<16x16xf32> to vector<16xf32>
    %95 = vector.shape_cast %94 : vector<16xf32> to vector<16x1xf32>
    %96 = vector.broadcast %95 : vector<16x1xf32> to vector<16x16xf32>
    %97 = arith.divf %93, %96 : vector<16x16xf32>
    %98 = vector.extract_strided_slice %41 {offsets = [0, 16], sizes = [16, 8], strides = [1, 1]} : vector<16x32xf32> to vector<16x8xf32>
    %cst_32 = arith.constant dense<0.000000e+00> : vector<16x8xf32>
    %99 = tpu.matmul %97, %98, %cst_32 {dimension_numbers = #tpu.dot_dimension_numbers<[1], [0], [0], [1], [0, 0, 1, 1], [], []>} : vector<16x16xf32>, vector<16x8xf32>, vector<16x8xf32> -> vector<16x8xf32>
    %100 = vector.extract_strided_slice %42 {offsets = [16, 0], sizes = [8, 32], strides = [1, 1]} : vector<32x32xf32> to vector<8x32xf32>
    %cst_33 = arith.constant dense<0.000000e+00> : vector<16x32xf32>
    %101 = tpu.matmul %99, %100, %cst_33 {dimension_numbers = #tpu.dot_dimension_numbers<[1], [0], [0], [1], [0, 0, 1, 1], [], []>} : vector<16x8xf32>, vector<8x32xf32>, vector<16x32xf32> -> vector<16x32xf32>
    %102 = arith.addf %82, %101 : vector<16x32xf32>
    %103 = vector.extract_strided_slice %33 {offsets = [0, 24], sizes = [16, 8], strides = [1, 1]} : vector<16x32xf32> to vector<16x8xf32>
    %104 = vector.extract_strided_slice %37 {offsets = [0, 24], sizes = [16, 8], strides = [1, 1]} : vector<16x32xf32> to vector<16x8xf32>
    %cst_34 = arith.constant dense<0.000000e+00> : vector<16x16xf32>
    %105 = tpu.matmul %103, %104, %cst_34 {dimension_numbers = #tpu.dot_dimension_numbers<[1], [1], [0], [0], [0, 0, 1, 0], [], []>} : vector<16x8xf32>, vector<16x8xf32>, vector<16x16xf32> -> vector<16x16xf32>
    %cst_35 = arith.constant 0.353553385 : f32
    %106 = vector.broadcast %cst_35 : f32 to vector<16x16xf32>
    %107 = arith.mulf %105, %106 : vector<16x16xf32>
    %108 = arith.addf %107, %3 : vector<16x16xf32>
    %cst_36 = arith.constant dense<0xFF800000> : vector<16xf32>
    %109 = vector.multi_reduction <maximumf>, %108, %cst_36 [1] : vector<16x16xf32> to vector<16xf32>
    %110 = vector.shape_cast %109 : vector<16xf32> to vector<16x1xf32>
    %111 = vector.broadcast %110 : vector<16x1xf32> to vector<16x16xf32>
    %112 = arith.subf %108, %111 : vector<16x16xf32>
    %113 = math.exp %112 : vector<16x16xf32>
    %cst_37 = arith.constant dense<0.000000e+00> : vector<16xf32>
    %114 = vector.multi_reduction <add>, %113, %cst_37 [1] : vector<16x16xf32> to vector<16xf32>
    %115 = vector.shape_cast %114 : vector<16xf32> to vector<16x1xf32>
    %116 = vector.broadcast %115 : vector<16x1xf32> to vector<16x16xf32>
    %117 = arith.divf %113, %116 : vector<16x16xf32>
    %118 = vector.extract_strided_slice %41 {offsets = [0, 24], sizes = [16, 8], strides = [1, 1]} : vector<16x32xf32> to vector<16x8xf32>
    %cst_38 = arith.constant dense<0.000000e+00> : vector<16x8xf32>
    %119 = tpu.matmul %117, %118, %cst_38 {dimension_numbers = #tpu.dot_dimension_numbers<[1], [0], [0], [1], [0, 0, 1, 1], [], []>} : vector<16x16xf32>, vector<16x8xf32>, vector<16x8xf32> -> vector<16x8xf32>
    %120 = vector.extract_strided_slice %42 {offsets = [24, 0], sizes = [8, 32], strides = [1, 1]} : vector<32x32xf32> to vector<8x32xf32>
    %cst_39 = arith.constant dense<0.000000e+00> : vector<16x32xf32>
    %121 = tpu.matmul %119, %120, %cst_39 {dimension_numbers = #tpu.dot_dimension_numbers<[1], [0], [0], [1], [0, 0, 1, 1], [], []>} : vector<16x8xf32>, vector<8x32xf32>, vector<16x32xf32> -> vector<16x32xf32>
    %122 = arith.addf %102, %121 : vector<16x32xf32>
    %123 = vector.broadcast %43 : vector<1x32xf32> to vector<16x32xf32>
    %124 = arith.addf %122, %123 : vector<16x32xf32>
    %125 = arith.addf %27, %124 : vector<16x32xf32>
    %126 = vector.extract_strided_slice %2 {offsets = [12, 0], sizes = [1, 32], strides = [1, 1]} : vector<16x32xf32> to vector<1x32xf32>
    %127 = vector.extract_strided_slice %2 {offsets = [13, 0], sizes = [1, 32], strides = [1, 1]} : vector<16x32xf32> to vector<1x32xf32>
    %cst_40 = arith.constant dense<0.000000e+00> : vector<16xf32>
    %128 = vector.multi_reduction <add>, %1, %cst_40 [1] : vector<16x32xf32> to vector<16xf32>
    %129 = vector.shape_cast %128 : vector<16xf32> to vector<16x1xf32>
    %cst_41 = arith.constant 3.200000e+01 : f32
    %130 = vector.broadcast %cst_41 : f32 to vector<16x1xf32>
    %131 = arith.divf %129, %130 : vector<16x1xf32>
    %132 = vector.broadcast %131 : vector<16x1xf32> to vector<16x32xf32>
    %133 = arith.subf %1, %132 : vector<16x32xf32>
    %134 = arith.mulf %133, %133 : vector<16x32xf32>
    %cst_42 = arith.constant dense<0.000000e+00> : vector<16xf32>
    %135 = vector.multi_reduction <add>, %134, %cst_42 [1] : vector<16x32xf32> to vector<16xf32>
    %136 = vector.shape_cast %135 : vector<16xf32> to vector<16x1xf32>
    %cst_43 = arith.constant 3.200000e+01 : f32
    %137 = vector.broadcast %cst_43 : f32 to vector<16x1xf32>
    %138 = arith.divf %136, %137 : vector<16x1xf32>
    %139 = vector.broadcast %131 : vector<16x1xf32> to vector<16x32xf32>
    %140 = arith.subf %1, %139 : vector<16x32xf32>
    %cst_44 = arith.constant 9.99999974E-6 : f32
    %141 = vector.broadcast %cst_44 : f32 to vector<16x1xf32>
    %142 = arith.addf %138, %141 : vector<16x1xf32>
    %143 = math.rsqrt %142 : vector<16x1xf32>
    %144 = vector.broadcast %143 : vector<16x1xf32> to vector<16x32xf32>
    %145 = arith.mulf %140, %144 : vector<16x32xf32>
    %146 = vector.broadcast %126 : vector<1x32xf32> to vector<16x32xf32>
    %147 = arith.mulf %145, %146 : vector<16x32xf32>
    %148 = vector.broadcast %127 : vector<1x32xf32> to vector<16x32xf32>
    %149 = arith.addf %147, %148 : vector<16x32xf32>
    %c0_45 = arith.constant 0 : index
    %c0_46 = arith.constant 0 : index
    %150 = vector.load %arg4[%c0_45, %c0_46] : memref<32x32xf32, #tpu.memory_space<vmem>>, vector<32x32xf32>
    %cst_47 = arith.constant dense<0.000000e+00> : vector<16x32xf32>
    %151 = tpu.matmul %125, %150, %cst_47 {dimension_numbers = #tpu.dot_dimension_numbers<[1], [0], [0], [1], [0, 0, 1, 1], [], []>} : vector<16x32xf32>, vector<32x32xf32>, vector<16x32xf32> -> vector<16x32xf32>
    %152 = vector.extract_strided_slice %2 {offsets = [4, 0], sizes = [1, 32], strides = [1, 1]} : vector<16x32xf32> to vector<1x32xf32>
    %153 = vector.broadcast %152 : vector<1x32xf32> to vector<16x32xf32>
    %154 = arith.addf %151, %153 : vector<16x32xf32>
    %c0_48 = arith.constant 0 : index
    %c0_49 = arith.constant 0 : index
    %155 = vector.load %arg5[%c0_48, %c0_49] : memref<32x64xf32, #tpu.memory_space<vmem>>, vector<32x64xf32>
    %cst_50 = arith.constant dense<0.000000e+00> : vector<16x64xf32>
    %156 = tpu.matmul %149, %155, %cst_50 {dimension_numbers = #tpu.dot_dimension_numbers<[1], [0], [0], [1], [0, 0, 1, 1], [], []>} : vector<16x32xf32>, vector<32x64xf32>, vector<16x64xf32> -> vector<16x64xf32>
    %157 = vector.extract_strided_slice %156 {offsets = [0, 0], sizes = [16, 32], strides = [1, 1]} : vector<16x64xf32> to vector<16x32xf32>
    %158 = vector.extract_strided_slice %2 {offsets = [5, 0], sizes = [1, 32], strides = [1, 1]} : vector<16x32xf32> to vector<1x32xf32>
    %159 = vector.broadcast %158 : vector<1x32xf32> to vector<16x32xf32>
    %160 = arith.addf %157, %159 : vector<16x32xf32>
    %161 = vector.extract_strided_slice %156 {offsets = [0, 32], sizes = [16, 32], strides = [1, 1]} : vector<16x64xf32> to vector<16x32xf32>
    %162 = vector.extract_strided_slice %2 {offsets = [6, 0], sizes = [1, 32], strides = [1, 1]} : vector<16x32xf32> to vector<1x32xf32>
    %163 = vector.broadcast %162 : vector<1x32xf32> to vector<16x32xf32>
    %164 = arith.addf %161, %163 : vector<16x32xf32>
    %c0_51 = arith.constant 0 : index
    %c0_52 = arith.constant 0 : index
    %165 = vector.load %arg6[%c0_51, %c0_52] : memref<32x32xf32, #tpu.memory_space<vmem>>, vector<32x32xf32>
    %166 = vector.extract_strided_slice %2 {offsets = [7, 0], sizes = [1, 32], strides = [1, 1]} : vector<16x32xf32> to vector<1x32xf32>
    %167 = vector.extract_strided_slice %154 {offsets = [0, 0], sizes = [16, 8], strides = [1, 1]} : vector<16x32xf32> to vector<16x8xf32>
    %168 = vector.extract_strided_slice %160 {offsets = [0, 0], sizes = [16, 8], strides = [1, 1]} : vector<16x32xf32> to vector<16x8xf32>
    %cst_53 = arith.constant dense<0.000000e+00> : vector<16x16xf32>
    %169 = tpu.matmul %167, %168, %cst_53 {dimension_numbers = #tpu.dot_dimension_numbers<[1], [1], [0], [0], [0, 0, 1, 0], [], []>} : vector<16x8xf32>, vector<16x8xf32>, vector<16x16xf32> -> vector<16x16xf32>
    %cst_54 = arith.constant 0.353553385 : f32
    %170 = vector.broadcast %cst_54 : f32 to vector<16x16xf32>
    %171 = arith.mulf %169, %170 : vector<16x16xf32>
    %172 = arith.addf %171, %3 : vector<16x16xf32>
    %cst_55 = arith.constant dense<0xFF800000> : vector<16xf32>
    %173 = vector.multi_reduction <maximumf>, %172, %cst_55 [1] : vector<16x16xf32> to vector<16xf32>
    %174 = vector.shape_cast %173 : vector<16xf32> to vector<16x1xf32>
    %175 = vector.broadcast %174 : vector<16x1xf32> to vector<16x16xf32>
    %176 = arith.subf %172, %175 : vector<16x16xf32>
    %177 = math.exp %176 : vector<16x16xf32>
    %cst_56 = arith.constant dense<0.000000e+00> : vector<16xf32>
    %178 = vector.multi_reduction <add>, %177, %cst_56 [1] : vector<16x16xf32> to vector<16xf32>
    %179 = vector.shape_cast %178 : vector<16xf32> to vector<16x1xf32>
    %180 = vector.broadcast %179 : vector<16x1xf32> to vector<16x16xf32>
    %181 = arith.divf %177, %180 : vector<16x16xf32>
    %182 = vector.extract_strided_slice %164 {offsets = [0, 0], sizes = [16, 8], strides = [1, 1]} : vector<16x32xf32> to vector<16x8xf32>
    %cst_57 = arith.constant dense<0.000000e+00> : vector<16x8xf32>
    %183 = tpu.matmul %181, %182, %cst_57 {dimension_numbers = #tpu.dot_dimension_numbers<[1], [0], [0], [1], [0, 0, 1, 1], [], []>} : vector<16x16xf32>, vector<16x8xf32>, vector<16x8xf32> -> vector<16x8xf32>
    %184 = vector.extract_strided_slice %165 {offsets = [0, 0], sizes = [8, 32], strides = [1, 1]} : vector<32x32xf32> to vector<8x32xf32>
    %cst_58 = arith.constant dense<0.000000e+00> : vector<16x32xf32>
    %185 = tpu.matmul %183, %184, %cst_58 {dimension_numbers = #tpu.dot_dimension_numbers<[1], [0], [0], [1], [0, 0, 1, 1], [], []>} : vector<16x8xf32>, vector<8x32xf32>, vector<16x32xf32> -> vector<16x32xf32>
    %186 = vector.extract_strided_slice %154 {offsets = [0, 8], sizes = [16, 8], strides = [1, 1]} : vector<16x32xf32> to vector<16x8xf32>
    %187 = vector.extract_strided_slice %160 {offsets = [0, 8], sizes = [16, 8], strides = [1, 1]} : vector<16x32xf32> to vector<16x8xf32>
    %cst_59 = arith.constant dense<0.000000e+00> : vector<16x16xf32>
    %188 = tpu.matmul %186, %187, %cst_59 {dimension_numbers = #tpu.dot_dimension_numbers<[1], [1], [0], [0], [0, 0, 1, 0], [], []>} : vector<16x8xf32>, vector<16x8xf32>, vector<16x16xf32> -> vector<16x16xf32>
    %cst_60 = arith.constant 0.353553385 : f32
    %189 = vector.broadcast %cst_60 : f32 to vector<16x16xf32>
    %190 = arith.mulf %188, %189 : vector<16x16xf32>
    %191 = arith.addf %190, %3 : vector<16x16xf32>
    %cst_61 = arith.constant dense<0xFF800000> : vector<16xf32>
    %192 = vector.multi_reduction <maximumf>, %191, %cst_61 [1] : vector<16x16xf32> to vector<16xf32>
    %193 = vector.shape_cast %192 : vector<16xf32> to vector<16x1xf32>
    %194 = vector.broadcast %193 : vector<16x1xf32> to vector<16x16xf32>
    %195 = arith.subf %191, %194 : vector<16x16xf32>
    %196 = math.exp %195 : vector<16x16xf32>
    %cst_62 = arith.constant dense<0.000000e+00> : vector<16xf32>
    %197 = vector.multi_reduction <add>, %196, %cst_62 [1] : vector<16x16xf32> to vector<16xf32>
    %198 = vector.shape_cast %197 : vector<16xf32> to vector<16x1xf32>
    %199 = vector.broadcast %198 : vector<16x1xf32> to vector<16x16xf32>
    %200 = arith.divf %196, %199 : vector<16x16xf32>
    %201 = vector.extract_strided_slice %164 {offsets = [0, 8], sizes = [16, 8], strides = [1, 1]} : vector<16x32xf32> to vector<16x8xf32>
    %cst_63 = arith.constant dense<0.000000e+00> : vector<16x8xf32>
    %202 = tpu.matmul %200, %201, %cst_63 {dimension_numbers = #tpu.dot_dimension_numbers<[1], [0], [0], [1], [0, 0, 1, 1], [], []>} : vector<16x16xf32>, vector<16x8xf32>, vector<16x8xf32> -> vector<16x8xf32>
    %203 = vector.extract_strided_slice %165 {offsets = [8, 0], sizes = [8, 32], strides = [1, 1]} : vector<32x32xf32> to vector<8x32xf32>
    %cst_64 = arith.constant dense<0.000000e+00> : vector<16x32xf32>
    %204 = tpu.matmul %202, %203, %cst_64 {dimension_numbers = #tpu.dot_dimension_numbers<[1], [0], [0], [1], [0, 0, 1, 1], [], []>} : vector<16x8xf32>, vector<8x32xf32>, vector<16x32xf32> -> vector<16x32xf32>
    %205 = arith.addf %185, %204 : vector<16x32xf32>
    %206 = vector.extract_strided_slice %154 {offsets = [0, 16], sizes = [16, 8], strides = [1, 1]} : vector<16x32xf32> to vector<16x8xf32>
    %207 = vector.extract_strided_slice %160 {offsets = [0, 16], sizes = [16, 8], strides = [1, 1]} : vector<16x32xf32> to vector<16x8xf32>
    %cst_65 = arith.constant dense<0.000000e+00> : vector<16x16xf32>
    %208 = tpu.matmul %206, %207, %cst_65 {dimension_numbers = #tpu.dot_dimension_numbers<[1], [1], [0], [0], [0, 0, 1, 0], [], []>} : vector<16x8xf32>, vector<16x8xf32>, vector<16x16xf32> -> vector<16x16xf32>
    %cst_66 = arith.constant 0.353553385 : f32
    %209 = vector.broadcast %cst_66 : f32 to vector<16x16xf32>
    %210 = arith.mulf %208, %209 : vector<16x16xf32>
    %211 = arith.addf %210, %3 : vector<16x16xf32>
    %cst_67 = arith.constant dense<0xFF800000> : vector<16xf32>
    %212 = vector.multi_reduction <maximumf>, %211, %cst_67 [1] : vector<16x16xf32> to vector<16xf32>
    %213 = vector.shape_cast %212 : vector<16xf32> to vector<16x1xf32>
    %214 = vector.broadcast %213 : vector<16x1xf32> to vector<16x16xf32>
    %215 = arith.subf %211, %214 : vector<16x16xf32>
    %216 = math.exp %215 : vector<16x16xf32>
    %cst_68 = arith.constant dense<0.000000e+00> : vector<16xf32>
    %217 = vector.multi_reduction <add>, %216, %cst_68 [1] : vector<16x16xf32> to vector<16xf32>
    %218 = vector.shape_cast %217 : vector<16xf32> to vector<16x1xf32>
    %219 = vector.broadcast %218 : vector<16x1xf32> to vector<16x16xf32>
    %220 = arith.divf %216, %219 : vector<16x16xf32>
    %221 = vector.extract_strided_slice %164 {offsets = [0, 16], sizes = [16, 8], strides = [1, 1]} : vector<16x32xf32> to vector<16x8xf32>
    %cst_69 = arith.constant dense<0.000000e+00> : vector<16x8xf32>
    %222 = tpu.matmul %220, %221, %cst_69 {dimension_numbers = #tpu.dot_dimension_numbers<[1], [0], [0], [1], [0, 0, 1, 1], [], []>} : vector<16x16xf32>, vector<16x8xf32>, vector<16x8xf32> -> vector<16x8xf32>
    %223 = vector.extract_strided_slice %165 {offsets = [16, 0], sizes = [8, 32], strides = [1, 1]} : vector<32x32xf32> to vector<8x32xf32>
    %cst_70 = arith.constant dense<0.000000e+00> : vector<16x32xf32>
    %224 = tpu.matmul %222, %223, %cst_70 {dimension_numbers = #tpu.dot_dimension_numbers<[1], [0], [0], [1], [0, 0, 1, 1], [], []>} : vector<16x8xf32>, vector<8x32xf32>, vector<16x32xf32> -> vector<16x32xf32>
    %225 = arith.addf %205, %224 : vector<16x32xf32>
    %226 = vector.extract_strided_slice %154 {offsets = [0, 24], sizes = [16, 8], strides = [1, 1]} : vector<16x32xf32> to vector<16x8xf32>
    %227 = vector.extract_strided_slice %160 {offsets = [0, 24], sizes = [16, 8], strides = [1, 1]} : vector<16x32xf32> to vector<16x8xf32>
    %cst_71 = arith.constant dense<0.000000e+00> : vector<16x16xf32>
    %228 = tpu.matmul %226, %227, %cst_71 {dimension_numbers = #tpu.dot_dimension_numbers<[1], [1], [0], [0], [0, 0, 1, 0], [], []>} : vector<16x8xf32>, vector<16x8xf32>, vector<16x16xf32> -> vector<16x16xf32>
    %cst_72 = arith.constant 0.353553385 : f32
    %229 = vector.broadcast %cst_72 : f32 to vector<16x16xf32>
    %230 = arith.mulf %228, %229 : vector<16x16xf32>
    %231 = arith.addf %230, %3 : vector<16x16xf32>
    %cst_73 = arith.constant dense<0xFF800000> : vector<16xf32>
    %232 = vector.multi_reduction <maximumf>, %231, %cst_73 [1] : vector<16x16xf32> to vector<16xf32>
    %233 = vector.shape_cast %232 : vector<16xf32> to vector<16x1xf32>
    %234 = vector.broadcast %233 : vector<16x1xf32> to vector<16x16xf32>
    %235 = arith.subf %231, %234 : vector<16x16xf32>
    %236 = math.exp %235 : vector<16x16xf32>
    %cst_74 = arith.constant dense<0.000000e+00> : vector<16xf32>
    %237 = vector.multi_reduction <add>, %236, %cst_74 [1] : vector<16x16xf32> to vector<16xf32>
    %238 = vector.shape_cast %237 : vector<16xf32> to vector<16x1xf32>
    %239 = vector.broadcast %238 : vector<16x1xf32> to vector<16x16xf32>
    %240 = arith.divf %236, %239 : vector<16x16xf32>
    %241 = vector.extract_strided_slice %164 {offsets = [0, 24], sizes = [16, 8], strides = [1, 1]} : vector<16x32xf32> to vector<16x8xf32>
    %cst_75 = arith.constant dense<0.000000e+00> : vector<16x8xf32>
    %242 = tpu.matmul %240, %241, %cst_75 {dimension_numbers = #tpu.dot_dimension_numbers<[1], [0], [0], [1], [0, 0, 1, 1], [], []>} : vector<16x16xf32>, vector<16x8xf32>, vector<16x8xf32> -> vector<16x8xf32>
    %243 = vector.extract_strided_slice %165 {offsets = [24, 0], sizes = [8, 32], strides = [1, 1]} : vector<32x32xf32> to vector<8x32xf32>
    %cst_76 = arith.constant dense<0.000000e+00> : vector<16x32xf32>
    %244 = tpu.matmul %242, %243, %cst_76 {dimension_numbers = #tpu.dot_dimension_numbers<[1], [0], [0], [1], [0, 0, 1, 1], [], []>} : vector<16x8xf32>, vector<8x32xf32>, vector<16x32xf32> -> vector<16x32xf32>
    %245 = arith.addf %225, %244 : vector<16x32xf32>
    %246 = vector.broadcast %166 : vector<1x32xf32> to vector<16x32xf32>
    %247 = arith.addf %245, %246 : vector<16x32xf32>
    %248 = arith.addf %125, %247 : vector<16x32xf32>
    %249 = vector.extract_strided_slice %2 {offsets = [14, 0], sizes = [1, 32], strides = [1, 1]} : vector<16x32xf32> to vector<1x32xf32>
    %250 = vector.extract_strided_slice %2 {offsets = [15, 0], sizes = [1, 32], strides = [1, 1]} : vector<16x32xf32> to vector<1x32xf32>
    %cst_77 = arith.constant dense<0.000000e+00> : vector<16xf32>
    %251 = vector.multi_reduction <add>, %248, %cst_77 [1] : vector<16x32xf32> to vector<16xf32>
    %252 = vector.shape_cast %251 : vector<16xf32> to vector<16x1xf32>
    %cst_78 = arith.constant 3.200000e+01 : f32
    %253 = vector.broadcast %cst_78 : f32 to vector<16x1xf32>
    %254 = arith.divf %252, %253 : vector<16x1xf32>
    %255 = vector.broadcast %254 : vector<16x1xf32> to vector<16x32xf32>
    %256 = arith.subf %248, %255 : vector<16x32xf32>
    %257 = arith.mulf %256, %256 : vector<16x32xf32>
    %cst_79 = arith.constant dense<0.000000e+00> : vector<16xf32>
    %258 = vector.multi_reduction <add>, %257, %cst_79 [1] : vector<16x32xf32> to vector<16xf32>
    %259 = vector.shape_cast %258 : vector<16xf32> to vector<16x1xf32>
    %cst_80 = arith.constant 3.200000e+01 : f32
    %260 = vector.broadcast %cst_80 : f32 to vector<16x1xf32>
    %261 = arith.divf %259, %260 : vector<16x1xf32>
    %262 = vector.broadcast %254 : vector<16x1xf32> to vector<16x32xf32>
    %263 = arith.subf %248, %262 : vector<16x32xf32>
    %cst_81 = arith.constant 9.99999974E-6 : f32
    %264 = vector.broadcast %cst_81 : f32 to vector<16x1xf32>
    %265 = arith.addf %261, %264 : vector<16x1xf32>
    %266 = math.rsqrt %265 : vector<16x1xf32>
    %267 = vector.broadcast %266 : vector<16x1xf32> to vector<16x32xf32>
    %268 = arith.mulf %263, %267 : vector<16x32xf32>
    %269 = vector.broadcast %249 : vector<1x32xf32> to vector<16x32xf32>
    %270 = arith.mulf %268, %269 : vector<16x32xf32>
    %271 = vector.broadcast %250 : vector<1x32xf32> to vector<16x32xf32>
    %272 = arith.addf %270, %271 : vector<16x32xf32>
    %c0_82 = arith.constant 0 : index
    %c0_83 = arith.constant 0 : index
    %273 = vector.load %arg7[%c0_82, %c0_83] : memref<32x32xf32, #tpu.memory_space<vmem>>, vector<32x32xf32>
    %cst_84 = arith.constant dense<0.000000e+00> : vector<16x32xf32>
    %274 = tpu.matmul %272, %273, %cst_84 {dimension_numbers = #tpu.dot_dimension_numbers<[1], [0], [0], [1], [0, 0, 1, 1], [], []>} : vector<16x32xf32>, vector<32x32xf32>, vector<16x32xf32> -> vector<16x32xf32>
    %275 = vector.extract_strided_slice %2 {offsets = [8, 0], sizes = [1, 32], strides = [1, 1]} : vector<16x32xf32> to vector<1x32xf32>
    %276 = vector.broadcast %275 : vector<1x32xf32> to vector<16x32xf32>
    %277 = arith.addf %274, %276 : vector<16x32xf32>
    %cst_85 = arith.constant 0.000000e+00 : f32
    %278 = vector.broadcast %cst_85 : f32 to vector<16x32xf32>
    %279 = arith.maximumf %277, %278 : vector<16x32xf32>
    %c0_86 = arith.constant 0 : index
    %c0_87 = arith.constant 0 : index
    %280 = vector.load %arg8[%c0_86, %c0_87] : memref<32x32xf32, #tpu.memory_space<vmem>>, vector<32x32xf32>
    %cst_88 = arith.constant dense<0.000000e+00> : vector<16x32xf32>
    %281 = tpu.matmul %279, %280, %cst_88 {dimension_numbers = #tpu.dot_dimension_numbers<[1], [0], [0], [1], [0, 0, 1, 1], [], []>} : vector<16x32xf32>, vector<32x32xf32>, vector<16x32xf32> -> vector<16x32xf32>
    %282 = vector.extract_strided_slice %2 {offsets = [9, 0], sizes = [1, 32], strides = [1, 1]} : vector<16x32xf32> to vector<1x32xf32>
    %283 = vector.broadcast %282 : vector<1x32xf32> to vector<16x32xf32>
    %284 = arith.addf %281, %283 : vector<16x32xf32>
    %285 = arith.addf %272, %284 : vector<16x32xf32>
    %c0_89 = arith.constant 0 : index
    %c0_90 = arith.constant 0 : index
    %286 = vector.load %arg11[%c0_89, %c0_90] : memref<16x32xf32, #tpu.memory_space<vmem>>, vector<16x32xf32>
    tpu.vector_store %arg11[%c0_89, %c0_90], %285 {strides = array<i32>} : memref<16x32xf32, #tpu.memory_space<vmem>>, vector<16x32xf32>,
    return
  }
}

</mosaic_0001>

<bundles_post_ra>
// kernel: tpu_custom_call.1
= control target key start
LH: loop header
LB: loop body
LE: loop exit
PB: predicated region body
PF: predicated region fallthrough
CT: control target
= control target key end

     0   :  { %16 = vsyncpa [#allocation3], 0  ;;  %s4641_s0 = inlined_call_operand.hbm [shape: f32[16,32], index: 0, kind: input, shape index: {}]   ;;  %s4642_s1 = inlined_call_operand.hbm [shape: f32[16,32], index: 1, kind: input, shape index: {}]   ;;  %s4643_s2 = inlined_call_operand.hbm [shape: f32[32,96], index: 2, kind: input, shape index: {}]   ;;  %s4644_s3 = inlined_call_operand.hbm [shape: f32[32,32], index: 3, kind: input, shape index: {}]   ;;  %s4645_s4 = inlined_call_operand.hbm [shape: f32[32,32], index: 4, kind: input, shape index: {}]   ;;  %s4646_s5 = inlined_call_operand.hbm [shape: f32[32,64], index: 5, kind: input, shape index: {}]   ;;  %s4647_s6 = inlined_call_operand.hbm [shape: f32[32,32], index: 6, kind: input, shape index: {}]   ;;  %s4648_s7 = inlined_call_operand.hbm [shape: f32[32,32], index: 7, kind: input, shape index: {}]   ;;  %s4649_s8 = inlined_call_operand.hbm [shape: f32[32,32], index: 8, kind: input, shape index: {}]   ;;  %s4650_s9 = inlined_call_operand.vmem [shape: f32[16,32], index: 9, kind: input, shape index: {}]   ;;  %s4651_s10 = inlined_call_operand.vmem [shape: f32[16,16], index: 10, kind: input, shape index: {}]   ;;  %s4652_s11 = inlined_call_operand.hbm [shape: f32[16,32], index: 11, kind: output, shape index: {}]  }
   0x1   :  { %17 = vsyncpa [#allocation6], 0 }
   0x2   :  { %18 = vsyncpa [#allocation9], 0 }
   0x3   :  { %19 = vsyncpa [#allocation12], 0 }
   0x4   :  { %20 = vsyncpa [#allocation15], 0 }
   0x5   :  { %21 = vsyncpa [#allocation4], 0  ;;  %s4046_s17 = smov [#allocation5]   ;;  %s4047_s19 = smov [#allocation8]  }
   0x6   :  { %s39_s18 = sshll.u32 %s4046_s17, 4  ;;  %s63_s20 = sshll.u32 %s4047_s19, 4  ;;  %s40_s18 = int_to_ptr.vmem [resolvable:$true] %s39_s18  ;;  %s4130_s20 = int_to_ptr.vmem [resolvable:$true] %s63_s20 }
   0x7   :  { %s3814_s23 = scalar_lea.hbm %s4642_s1, 256 }
   0x8   :  { %p3815_p0 = scmp.ne.s32.totalorder %s4642_s1, %s3814_s23  ;;  %p3818_p1 = scmp.lt.u32.totalorder %s3814_s23, %s4642_s1 }
   0xa   :  { %p3820_p2 = pnand %p3818_p1, %p3815_p0 }
   0xc   :  { %3823 = shalt.err (!%p3820_p2)
}
   0xd   :  { %s3824_s28 = scalar_lea.vmem %s40_s18, 256  ;;  %p3829_p4 = scmp.lt.s32.totalorder %s40_s18, %s40_s18 }
   0xe   :  { %p3825_p3 = scmp.ne.s32.totalorder %s40_s18, %s3824_s28  ;;  %p3830_p5 = scmp.lt.s32.totalorder %s3824_s28, %s3824_s28 }
  0x10   :  { %p3831_p6 = por %p3830_p5, %p3829_p4 }
  0x12   :  { %p3832_p7 = pnand %p3831_p6, %p3825_p3 }
  0x14   :  { %3835 = shalt.err (!%p3832_p7)
}
  0x15   :  { %s4048_s29 = smov 128   ;;  %s4049_s30 = smov 8  }
  0x16   :  { %45 = dma.hbm_to_vmem [thread:$0]  %s4642_s1, 256, %s40_s18, [#allocation6], %s4048_s29, %s4048_s29, %s4049_s30  }
  0x17   :  { %s3836_s16 = scalar_lea.hbm %s4644_s3, 512 }
  0x18   :  { %p3837_p8 = scmp.ne.s32.totalorder %s4644_s3, %s3836_s16  ;;  %p3840_p9 = scmp.lt.u32.totalorder %s3836_s16, %s4644_s3 }
  0x1a   :  { %p3842_p10 = pnand %p3840_p9, %p3837_p8 }
  0x1c   :  { %3845 = shalt.err (!%p3842_p10)
}
  0x1d   :  { %s3846_s23 = scalar_lea.vmem %s4130_s20, 512  ;;  %p3851_p12 = scmp.lt.s32.totalorder %s4130_s20, %s4130_s20 }
  0x1e   :  { %p3847_p11 = scmp.ne.s32.totalorder %s4130_s20, %s3846_s23  ;;  %p3852_p13 = scmp.lt.s32.totalorder %s3846_s23, %s3846_s23 }
  0x20   :  { %p3853_p0 = por %p3852_p13, %p3851_p12 }
  0x22   :  { %p3854_p1 = pnand %p3853_p0, %p3847_p11 }
  0x24   :  { %3857 = shalt.err (!%p3854_p1)
}
  0x25   :  { %69 = dma.hbm_to_vmem [thread:$0]  %s4644_s3, 512, %s4130_s20, [#allocation9], %s4048_s29, %s4048_s29, %s4049_s30  }
  0x26   :  { %s4050_s24 = smov [#allocation11]   ;;  %s4051_s26 = smov [#allocation14]  }
  0x27   :  { %s87_s25 = sshll.u32 %s4050_s24, 4  ;;  %s111_s27 = sshll.u32 %s4051_s26, 4  ;;  %s88_s25 = int_to_ptr.vmem [resolvable:$true] %s87_s25  ;;  %s4167_s27 = int_to_ptr.vmem [resolvable:$true] %s111_s27 }
  0x28   :  { %s3858_s13 = scalar_lea.hbm %s4646_s5, 512 }
  0x29   :  { %p3859_p2 = scmp.ne.s32.totalorder %s4646_s5, %s3858_s13  ;;  %p3862_p3 = scmp.lt.u32.totalorder %s3858_s13, %s4646_s5 }
  0x2b   :  { %p3864_p4 = pnand %p3862_p3, %p3859_p2 }
  0x2d   :  { %3867 = shalt.err (!%p3864_p4)
}
  0x2e   :  { %s3868_s3 = scalar_lea.vmem %s88_s25, 512  ;;  %p3873_p6 = scmp.lt.s32.totalorder %s88_s25, %s88_s25 }
  0x2f   :  { %p3869_p5 = scmp.ne.s32.totalorder %s88_s25, %s3868_s3  ;;  %p3874_p7 = scmp.lt.s32.totalorder %s3868_s3, %s3868_s3 }
  0x31   :  { %p3875_p8 = por %p3874_p7, %p3873_p6 }
  0x33   :  { %p3876_p9 = pnand %p3875_p8, %p3869_p5 }
  0x35   :  { %3879 = shalt.err (!%p3876_p9)
}
  0x36   :  { %93 = dma.hbm_to_vmem [thread:$0]  %s4646_s5, 512, %s88_s25, [#allocation12], %s4048_s29, %s4048_s29, %s4049_s30  }
  0x37   :  { %s3880_s23 = scalar_lea.hbm %s4648_s7, 512 }
  0x38   :  { %p3881_p10 = scmp.ne.s32.totalorder %s4648_s7, %s3880_s23  ;;  %p3884_p11 = scmp.lt.u32.totalorder %s3880_s23, %s4648_s7 }
  0x3a   :  { %p3886_p12 = pnand %p3884_p11, %p3881_p10 }
  0x3c   :  { %3889 = shalt.err (!%p3886_p12)
}
  0x3d   :  { %s3890_s28 = scalar_lea.vmem %s4167_s27, 512  ;;  %p3895_p0 = scmp.lt.s32.totalorder %s4167_s27, %s4167_s27 }
  0x3e   :  { %p3891_p13 = scmp.ne.s32.totalorder %s4167_s27, %s3890_s28  ;;  %p3896_p1 = scmp.lt.s32.totalorder %s3890_s28, %s3890_s28 }
  0x40   :  { %p3897_p2 = por %p3896_p1, %p3895_p0 }
  0x42   :  { %p3898_p3 = pnand %p3897_p2, %p3891_p13 }
  0x44   :  { %3901 = shalt.err (!%p3898_p3)
}
  0x45   :  { %117 = dma.hbm_to_vmem [thread:$0]  %s4648_s7, 512, %s4167_s27, [#allocation15], %s4048_s29, %s4048_s29, %s4049_s30  }
  0x46   :  { %s4052_s12 = smov [#allocation2]   ;;  %s4053_s14 = smov [#allocation7]  }
  0x47   :  { %s27_s13 = sshll.u32 %s4052_s12, 4  ;;  %s51_s15 = sshll.u32 %s4053_s14, 4  ;;  %s28_s13 = int_to_ptr.vmem [resolvable:$true] %s27_s13  ;;  %s4204_s15 = int_to_ptr.vmem [resolvable:$true] %s51_s15 }
  0x48   :  { %s3902_s3 = scalar_lea.hbm %s4641_s0, 256 }
  0x49   :  { %p3903_p4 = scmp.ne.s32.totalorder %s4641_s0, %s3902_s3  ;;  %p3906_p5 = scmp.lt.u32.totalorder %s3902_s3, %s4641_s0 }
  0x4b   :  { %p3908_p6 = pnand %p3906_p5, %p3903_p4 }
  0x4d   :  { %3911 = shalt.err (!%p3908_p6)
}
  0x4e   :  { %s3912_s7 = scalar_lea.vmem %s28_s13, 256  ;;  %p3917_p8 = scmp.lt.s32.totalorder %s28_s13, %s28_s13 }
  0x4f   :  { %p3913_p7 = scmp.ne.s32.totalorder %s28_s13, %s3912_s7  ;;  %p3918_p9 = scmp.lt.s32.totalorder %s3912_s7, %s3912_s7 }
  0x51   :  { %p3919_p10 = por %p3918_p9, %p3917_p8 }
  0x53   :  { %p3920_p11 = pnand %p3919_p10, %p3913_p7 }
  0x55   :  { %3923 = shalt.err (!%p3920_p11)
}
  0x56   :  { %33 = dma.hbm_to_vmem [thread:$0]  %s4641_s0, 256, %s28_s13, [#allocation3], %s4048_s29, %s4048_s29, %s4049_s30  }
  0x57   :  { %s3924_s24 = scalar_lea.hbm %s4643_s2, 512 }
  0x58   :  { %p3925_p12 = scmp.ne.s32.totalorder %s4643_s2, %s3924_s24  ;;  %p3928_p13 = scmp.lt.u32.totalorder %s3924_s24, %s4643_s2 }
  0x5a   :  { %p3930_p0 = pnand %p3928_p13, %p3925_p12 }
  0x5c   :  { %3933 = shalt.err (!%p3930_p0)
}
  0x5d   :  { %s3934_s12 = scalar_lea.vmem %s4204_s15, 512  ;;  %p3939_p2 = scmp.lt.s32.totalorder %s4204_s15, %s4204_s15 }
  0x5e   :  { %p3935_p1 = scmp.ne.s32.totalorder %s4204_s15, %s3934_s12  ;;  %p3940_p3 = scmp.lt.s32.totalorder %s3934_s12, %s3934_s12 }
  0x60   :  { %p3941_p4 = por %p3940_p3, %p3939_p2 }
  0x62   :  { %p3942_p5 = pnand %p3941_p4, %p3935_p1 }
  0x64   :  { %3945 = shalt.err (!%p3942_p5)
}
  0x65   :  { %57 = dma.hbm_to_vmem [thread:$0]  %s4643_s2, 512, %s4204_s15, [#allocation6], %s4048_s29, %s4048_s29, %s4049_s30  }
  0x66   :  { %s4054_s14 = smov [#allocation10]   ;;  %s4055_s17 = smov [#allocation13]  }
  0x67   :  { %s75_s16 = sshll.u32 %s4054_s14, 4  ;;  %s99_s3 = sshll.u32 %s4055_s17, 4  ;;  %s76_s16 = int_to_ptr.vmem [resolvable:$true] %s75_s16  ;;  %s4241_s3 = int_to_ptr.vmem [resolvable:$true] %s99_s3 }
  0x68   :  { %s3946_s21 = scalar_lea.hbm %s4645_s4, 512 }
  0x69   :  { %p3947_p6 = scmp.ne.s32.totalorder %s4645_s4, %s3946_s21  ;;  %p3950_p7 = scmp.lt.u32.totalorder %s3946_s21, %s4645_s4 }
  0x6b   :  { %p3952_p8 = pnand %p3950_p7, %p3947_p6 }
  0x6d   :  { %3955 = shalt.err (!%p3952_p8)
}
  0x6e   :  { %s3956_s2 = scalar_lea.vmem %s76_s16, 512  ;;  %p3961_p10 = scmp.lt.s32.totalorder %s76_s16, %s76_s16 }
  0x6f   :  { %p3957_p9 = scmp.ne.s32.totalorder %s76_s16, %s3956_s2  ;;  %p3962_p11 = scmp.lt.s32.totalorder %s3956_s2, %s3956_s2 }
  0x71   :  { %p3963_p12 = por %p3962_p11, %p3961_p10 }
  0x73   :  { %p3964_p13 = pnand %p3963_p12, %p3957_p9 }
  0x75   :  { %3967 = shalt.err (!%p3964_p13)
}
  0x76   :  { %81 = dma.hbm_to_vmem [thread:$0]  %s4645_s4, 512, %s76_s16, [#allocation9], %s4048_s29, %s4048_s29, %s4049_s30  }
  0x77   :  { %s3968_s26 = scalar_lea.hbm %s4647_s6, 512 }
  0x78   :  { %p3969_p0 = scmp.ne.s32.totalorder %s4647_s6, %s3968_s26  ;;  %p3972_p1 = scmp.lt.u32.totalorder %s3968_s26, %s4647_s6 }
  0x7a   :  { %p3974_p2 = pnand %p3972_p1, %p3969_p0 }
  0x7c   :  { %3977 = shalt.err (!%p3974_p2)
}
  0x7d   :  { %s3978_s0 = scalar_lea.vmem %s4241_s3, 512  ;;  %p3983_p4 = scmp.lt.s32.totalorder %s4241_s3, %s4241_s3 }
  0x7e   :  { %p3979_p3 = scmp.ne.s32.totalorder %s4241_s3, %s3978_s0  ;;  %p3984_p5 = scmp.lt.s32.totalorder %s3978_s0, %s3978_s0 }
  0x80   :  { %p3985_p6 = por %p3984_p5, %p3983_p4 }
  0x82   :  { %p3986_p7 = pnand %p3985_p6, %p3979_p3 }
  0x84   :  { %3989 = shalt.err (!%p3986_p7)
}
  0x85   :  { %105 = dma.hbm_to_vmem [thread:$0]  %s4647_s6, 512, %s4241_s3, [#allocation12], %s4048_s29, %s4048_s29, %s4049_s30  }
  0x86   :  { %s4056_s14 = smov [#allocation16]   ;;  %s3990_s19 = scalar_lea.hbm %s4649_s8, 512 }
  0x87   :  { %s123_s16 = sshll.u32 %s4056_s14, 4  ;;  %p3991_p8 = scmp.ne.s32.totalorder %s4649_s8, %s3990_s19  ;;  %s124_s16 = int_to_ptr.vmem [resolvable:$true] %s123_s16 }
  0x88   :  { %p3994_p9 = scmp.lt.u32.totalorder %s3990_s19, %s4649_s8 }
  0x8a   :  { %p3996_p10 = pnand %p3994_p9, %p3991_p8 }
  0x8c   :  { %3999 = shalt.err (!%p3996_p10)
}
  0x8d   :  { %s4000_s23 = scalar_lea.vmem %s124_s16, 512  ;;  %p4005_p12 = scmp.lt.s32.totalorder %s124_s16, %s124_s16 }
  0x8e   :  { %p4001_p11 = scmp.ne.s32.totalorder %s124_s16, %s4000_s23  ;;  %p4006_p13 = scmp.lt.s32.totalorder %s4000_s23, %s4000_s23 }
  0x90   :  { %p4007_p0 = por %p4006_p13, %p4005_p12 }
  0x92   :  { %p4008_p1 = pnand %p4007_p0, %p4001_p11 }
  0x94   :  { %4011 = shalt.err (!%p4008_p1)
}
  0x95   :  { %129 = dma.hbm_to_vmem [thread:$0]  %s4649_s8, 512, %s124_s16, [#allocation15], %s4048_s29, %s4048_s29, %s4049_s30  }
  0x96   :  { %4034 = dma.done.wait [#allocation3], 256  }
  0x97   :  { %4035 = vsyncadd [#allocation3], 4294967040 }
  0x98   :  { %4036 = dma.done.wait [#allocation6], 768  }
  0x99   :  { %4037 = vsyncadd [#allocation6], 4294966528 }
  0x9a   :  { %4038 = dma.done.wait [#allocation9], 1024  }
  0x9b   :  { %4039 = vsyncadd [#allocation9], 4294966272 }
  0x9c   :  { %4040 = dma.done.wait [#allocation12], 1024  }
  0x9d   :  { %4041 = vsyncadd [#allocation12], 4294966272 }
  0x9e   :  { %4042 = dma.done.wait [#allocation15], 1024  }
  0x9f   :  { %4043 = vsyncadd [#allocation15], 4294966272  ;;  %vm169_vm0 = vcmask 261120   ;;  %v161_v0 = vld [vmem:[#allocation2] sm:$0xff]  ;;  %v162_v1 = vld [vmem:[#allocation2 + $0x8] sm:$0xff]  ;;  %v197_v20 = vlaneseq  ;;  %s4057_s15 = smov 32  }
  0xa0   :  { %v170_v2 = vsel %vm169_vm0, %v161_v0, 0.0  ;;  %v173_v3 = vsel %vm169_vm0, %v162_v1, 0.0  ;;  %v209_v14 = vld [vmem:[#allocation7] sm:$0xff]  ;;  %v210_v15 = vld [vmem:[#allocation7 + $0x8] sm:$0xff]  ;;  %v211_v16 = vld [vmem:[#allocation7 + $0x10] sm:$0xff]  ;;  %vm330_vm1 = vcmask 64512  }
  0xa1   :  { %171 = vadd.xlane.f32.xlu0 %v170_v2  ;;  %v3504_v17 = vpack.c.bf16 %v210_v15, %v209_v14  ;;  %v212_v18 = vld [vmem:[#allocation7 + $0x18] sm:$0xff]  ;;  %v4297_v21 = vshrl.u32 %v197_v20, 7  ;;  %v4302_v22 = vld [vmem:[%s4650_s9] sm:$0xff]  ;;  %v4313_v32 = vld [vmem:[%s4650_s9 + $0x8] sm:$0xff]  ;;  %s4058_s24 = smov 96   ;;  %vm420_vm3 = vcmask 130048  }
  0xa2   :  { %v3508_v19 = vpack.c.bf16 %v212_v18, %v211_v16  ;;  %vm4344_vm2 = vmpackc.low %vm330_vm1, %vm330_vm1  ;;  %v4357_v60 = vld [vmem:[%s4651_s10 + $0x8] sm:$0xff]  ;;  %v4362_v63 = vld [vmem:[%s4651_s10] sm:$0xff]  ;;  %s4059_s12 = smov 64   ;;  %s4060_s0 = smov 88  }
  0xa3   :  { %3505 = vmatprep.subr.bf16.mxu0 %v3504_v17  ;;  %v302_v23 = vsub.s32 1, %v4297_v21  ;;  %v199_v31 = vsub.s32 2, %v4297_v21  ;;  %v205_v33 = vsub.s32 3, %v4297_v21  ;;  %v296_v44 = vsub.s32 0, %v4297_v21  ;;  %s4061_s4 = smov 120   ;;  %s4062_s13 = smov 112  }
  0xa4   :  { %3507 = vmatpush3.bf16.msra.mxu0 %v3504_v17  ;;  %s4063_s14 = smov 80   ;;  %s4064_s16 = smov 72  }
  0xa5   :  { %174 = vadd.xlane.f32.xlu0 %v173_v3  ;;  %3509 = vmatprep.subr.bf16.mxu0 %v3508_v19  ;;  %v303_v24 = vrot.slane %v4302_v22, %v302_v23  ;;  %v200_v34 = vrot.slane %v4313_v32, %v199_v31  ;;  %v206_v37 = vrot.slane %v4313_v32, %v205_v33  ;;  %s4065_s17 = smov 104   ;;  %s4066_s20 = smov 56  }
  0xa6   :  { %v297_v45 = vrot.slane %v4302_v22, %v296_v44  ;;  %s4067_s19 = smov 48   ;;  %s4068_s21 = smov 40  }
  0xa8   :  { %3511 = vmatpush3.bf16.msra.mxu0 %v3508_v19 }
  0xbb   :  { %305 = vrot.lane.b32.xlu0 %v303_v24, %s4057_s15 }
 0x12e   :  { %v172_v4 = vpop.xlane.xlu0 %171 }
 0x12f   :  { %v177_v5 = vmul.f32 0.03125, %v172_v4 }
 0x131   :  { %v179_v6 = vsub.f32 %v161_v0, %v177_v5  ;;  %v313_v5 = vrot.slane %v4302_v22, %v199_v31 }
 0x132   :  { %v175_v7 = vpop.xlane.xlu0 %174 }
 0x133   :  { %v178_v8 = vmul.f32 0.03125, %v175_v7  ;;  %v181_v9 = vmul.f32 %v179_v6, %v179_v6 }
 0x135   :  { %v180_v10 = vsub.f32 %v162_v1, %v178_v8  ;;  %v183_v11 = vsel %vm169_vm0, %v181_v9, 0.0 }
 0x136   :  { %184 = vadd.xlane.f32.xlu1 %v183_v11  ;;  %v306_v46 = vpop.permute.xlu0 %305 }
 0x137   :  { %v182_v12 = vmul.f32 %v180_v10, %v180_v10 }
 0x139   :  { %v186_v13 = vsel %vm169_vm0, %v182_v12, 0.0 }
 0x13a   :  { %187 = vadd.xlane.f32.xlu1 %v186_v13 }
 0x1c3   :  { %v185_v25 = vpop.xlane.xlu1 %184 }
 0x1c4   :  { %v189_v26 = vmul.f32 0.03125, %v185_v25 }
 0x1c6   :  { %v191_v27 = vadd.f32 1e-05, %v189_v26 }
 0x1c7   :  { %v188_v28 = vpop.xlane.xlu1 %187 }
 0x1c8   :  { %3735 = vrsqrt.f32 %v191_v27  ;;  %v190_v29 = vmul.f32 0.03125, %v188_v28 }
 0x1ca   :  { %v192_v30 = vadd.f32 1e-05, %v190_v29 }
 0x1cc   :  { %3737 = vrsqrt.f32 %v192_v30 }
 0x1d2   :  { %v3736_v35 = vpop.eup %3735 }
 0x1d3   :  { %v195_v36 = vmul.f32 %v3736_v35, %v179_v6 }
 0x1d5   :  { %v201_v38 = vmul.f32 %v200_v34, %v195_v36 }
 0x1d6   :  { %v3738_v39 = vpop.eup %3737 }
 0x1d7   :  { %v196_v40 = vmul.f32 %v3738_v39, %v180_v10  ;;  %v4320_v41 = vadd.f32 %v206_v37, %v201_v38 }
 0x1d9   :  { %v202_v42 = vmul.f32 %v200_v34, %v196_v40  ;;  %3305 = vmatprep.mubr.msk.f32.mxu0 %vm169_vm0, %v4320_v41 }
 0x1db   :  { %v4324_v43 = vadd.f32 %v206_v37, %v202_v42 }
 0x1dd   :  { %3306 = vmatmul.mubr.msk.f32.vlgmr.msra.gmra.mrb[0].mxu0 %vm169_vm0, %v4324_v43 }
 0x2b0   :  { %v3307_v47 = vpop.f32.mrb[0].mxu0 }
 0x2b1   :  { %v4332_v48 = vadd.f32 %v3307_v47, %v297_v45  ;;  %v309_v49 = vadd.f32 %v3307_v47, %v306_v46  ;;  %v285_v50 = vpop.f32.mrb[1].mxu0 }
 0x2b2   :  { %v4334_v51 = vadd.f32 %v297_v45, %v285_v50  ;;  %v308_v52 = vadd.f32 %v306_v46, %v285_v50 }
 0x2b4   :  { %3312 = vmatprep.mubr.msk.f32.mxu1 %vm330_vm1, %v4334_v51  ;;  %v4338_v53 = vpack.i.bf16 %v309_v49, %v308_v52 }
 0x2b6   :  { %3661 = vrot.lane.b32.xlu1 %v4338_v53, %s4058_s24 }
 0x328   :  { %v3662_v54 = vpop.permute.xlu1 %3661 }
 0x329   :  { %v3664_v55 = vunpack.i.h.bf16 %v3662_v54  ;;  %v3663_v56 = vunpack.i.l.bf16 %v3662_v54 }
 0x32b   :  { %v3512_v58 = vpack.c.bf16 %v3664_v55, %v3663_v56 }
 0x32d   :  { %3514 = vmatprep.subr.msk.bf16.mxu1 %vm4344_vm2, %v3512_v58 }
 0x32e   :  { %3517 = vmatpush3.bf16.xpose.msk.msra.mxu1 %vm4344_vm2, %v3512_v58 }
 0x335   :  { %3313 = vmatmul.mubr.msk.f32.vlgmr.msra.gmra.mrb[0].mxu1 %vm330_vm1, %v4332_v48 }
 0x408   :  { %v3314_v59 = vpop.f32.mrb[0].mxu1 }
 0x409   :  { %v417_v61 = vmul.f32 0.35355338, %v3314_v59  ;;  %v407_v62 = vpop.f32.mrb[1].mxu1 }
 0x40a   :  { %v416_v0 = vmul.f32 0.35355338, %v407_v62 }
 0x40b   :  { %v419_v1 = vadd.f32 %v417_v61, %v4357_v60 }
 0x40c   :  { %v418_v2 = vadd.f32 %v416_v0, %v4362_v63 }
 0x40d   :  { %v424_v3 = vsel %vm420_vm3, %v419_v1, -inf }
 0x40e   :  { %425 = vmax.xlane.f32.xlu0 %v424_v3  ;;  %v421_v4 = vsel %vm420_vm3, %v418_v2, -inf }
 0x40f   :  { %422 = vmax.xlane.f32.xlu1 %v421_v4 }
 0x424   :  { %315 = vrot.lane.b32.xlu0 %v313_v5, %s4059_s12 }
 0x428   :  { %3671 = vrot.lane.b32.xlu0 %v4338_v53, %s4060_s0 }
 0x42c   :  { %534 = vrot.lane.b32.xlu0 %v4332_v48, %s4061_s4 }
 0x430   :  { %898 = vrot.lane.b32.xlu0 %v4334_v51, %s4062_s13 }
 0x49b   :  { %v426_v6 = vpop.xlane.xlu0 %425 }
 0x49c   :  { %v428_v11 = vsub.f32 %v419_v1, %v426_v6  ;;  %v423_v12 = vpop.xlane.xlu1 %422 }
 0x49d   :  { %v427_v14 = vsub.f32 %v418_v2, %v423_v12 }
 0x49e   :  { %v431_v13 = vmul.f32 1.442695, %v428_v11 }
 0x49f   :  { %v316_v7 = vpop.permute.xlu0 %315  ;;  %v429_v15 = vmul.f32 1.442695, %v427_v14 }
 0x4a0   :  { %v318_v8 = vadd.f32 %v316_v7, %v285_v50  ;;  %v319_v9 = vadd.f32 %v3307_v47, %v316_v7  ;;  %3739 = vpow2.f32 %v431_v13 }
 0x4a1   :  { %3741 = vpow2.f32 %v429_v15 }
 0x4a2   :  { %v4375_v10 = vpack.i.bf16 %v319_v9, %v318_v8 }
 0x4a3   :  { %v3672_v20 = vpop.permute.xlu0 %3671 }
 0x4a4   :  { %3666 = vrot.lane.b32.xlu1 %v4375_v10, %s4059_s12  ;;  %v3674_v25 = vunpack.i.h.bf16 %v3672_v20  ;;  %v3673_v26 = vunpack.i.l.bf16 %v3672_v20 }
 0x4a6   :  { %v3522_v30 = vpack.c.bf16 %v3674_v25, %v3673_v26 }
 0x4a7   :  { %v535_v47 = vpop.permute.xlu0 %534 }
 0x4aa   :  { %v3740_v16 = vpop.eup %3739 }
 0x4ab   :  { %v436_v17 = vsel %vm420_vm3, %v3740_v16, 0.0  ;;  %v3742_v18 = vpop.eup %3741  ;;  %v899_v49 = vpop.permute.xlu0 %898 }
 0x4ac   :  { %v433_v19 = vsel %vm420_vm3, %v3742_v18, 0.0 }
 0x4c8   :  { %437 = vadd.xlane.f32.xlu1 %v436_v17 }
 0x4cc   :  { %434 = vadd.xlane.f32.xlu1 %v433_v19 }
 0x4dd   :  { %532 = vrot.lane.b32.xlu1 %v4334_v51, %s4061_s4 }
 0x4e1   :  { %3676 = vrot.lane.b32.xlu1 %v4338_v53, %s4063_s14 }
 0x4e5   :  { %900 = vrot.lane.b32.xlu1 %v4332_v48, %s4062_s13 }
 0x516   :  { %v3667_v24 = vpop.permute.xlu1 %3666 }
 0x517   :  { %v3669_v27 = vunpack.i.h.bf16 %v3667_v24  ;;  %v3668_v28 = vunpack.i.l.bf16 %v3667_v24 }
 0x519   :  { %v3518_v29 = vpack.c.bf16 %v3669_v27, %v3668_v28 }
 0x51b   :  { %3519 = vmatprep.subr.bf16.mxu1 %v3518_v29 }
 0x51c   :  { %3521 = vmatpush3.bf16.msra.mxu1 %v3518_v29 }
 0x51d   :  { %3524 = vmatprep.subr.msk.bf16.mxu1 %vm4344_vm2, %v3522_v30 }
 0x555   :  { %v438_v31 = vpop.xlane.xlu1 %437 }
 0x556   :  { %3743 = vrcp.f32 %v438_v31 }
 0x559   :  { %v435_v34 = vpop.xlane.xlu1 %434 }
 0x55a   :  { %3745 = vrcp.f32 %v435_v34 }
 0x55d   :  { %v533_v35 = vpop.permute.xlu1 %532 }
 0x560   :  { %v3744_v37 = vpop.eup %3743 }
 0x561   :  { %v3677_v36 = vpop.permute.xlu1 %3676  ;;  %v442_v45 = vmul.f32 %v3744_v37, %v3740_v16 }
 0x562   :  { %v3679_v39 = vunpack.i.h.bf16 %v3677_v36  ;;  %v3678_v40 = vunpack.i.l.bf16 %v3677_v36 }
 0x564   :  { %v3746_v38 = vpop.eup %3745  ;;  %v3532_v46 = vpack.c.bf16 %v3679_v39, %v3678_v40 }
 0x565   :  { %v440_v42 = vmul.f32 %v3746_v38, %v3742_v18  ;;  %v901_v50 = vpop.permute.xlu1 %900 }
 0x567   :  { %3319 = vmatprep.mubr.msk.f32.mxu1 %vm420_vm3, %v440_v42 }
 0x568   :  { %3320 = vmatmul.mubr.msk.f32.vlgmr.msra.gmra.mrb[2].mxu1 %vm420_vm3, %v442_v45 }
 0x569   :  { %3527 = vmatpush3.bf16.xpose.msk.msra.mxu1 %vm4344_vm2, %v3522_v30  ;;  %3326 = vmatprep.mubr.msk.f32.mxu1 %vm330_vm1, %v533_v35 }
 0x56a   :  { %3534 = vmatprep.subr.msk.bf16.mxu1 %vm4344_vm2, %v3532_v46 }
 0x570   :  { %3327 = vmatmul.mubr.msk.f32.vlgmr.msra.gmra.mrb[4].mxu1 %vm330_vm1, %v535_v47 }
 0x571   :  { %3537 = vmatpush3.bf16.xpose.msk.msra.mxu1 %vm4344_vm2, %v3532_v46  ;;  %3350 = vmatprep.mubr.msk.f32.mxu1 %vm330_vm1, %v899_v49 }
 0x578   :  { %3351 = vmatmul.mubr.msk.f32.vlgmr.msra.gmra.mrb[6].mxu1 %vm330_vm1, %v901_v50 }
 0x63b   :  { %v4400_v52 = vpop.f32.mrb[2].mxu1 }
 0x63c   :  { %v4402_v54 = vpop.f32.mrb[3].mxu1 }
 0x643   :  { %v3328_v55 = vpop.f32.mrb[4].mxu1 }
 0x644   :  { %v624_v56 = vmul.f32 0.35355338, %v3328_v55  ;;  %v614_v58 = vpop.f32.mrb[5].mxu1 }
 0x645   :  { %v623_v59 = vmul.f32 0.35355338, %v614_v58 }
 0x646   :  { %v626_v61 = vadd.f32 %v624_v56, %v4357_v60 }
 0x647   :  { %v625_v62 = vadd.f32 %v623_v59, %v4362_v63 }
 0x648   :  { %v630_v0 = vsel %vm420_vm3, %v626_v61, -inf }
 0x649   :  { %631 = vmax.xlane.f32.xlu1 %v630_v0  ;;  %v627_v1 = vsel %vm420_vm3, %v625_v62, -inf }
 0x64a   :  { %628 = vmax.xlane.f32.xlu0 %v627_v1 }
 0x64b   :  { %v3352_v2 = vpop.f32.mrb[6].mxu1 }
 0x64c   :  { %v980_v3 = vpop.f32.mrb[7].mxu1  ;;  %v990_v4 = vmul.f32 0.35355338, %v3352_v2 }
 0x64d   :  { %v989_v27 = vmul.f32 0.35355338, %v980_v3 }
 0x64e   :  { %v992_v5 = vadd.f32 %v990_v4, %v4357_v60  ;;  %v321_v4 = vld [vmem:[#allocation8 + $0x8] sm:$0xff] }
 0x64f   :  { %v991_v28 = vadd.f32 %v989_v27, %v4362_v63 }
 0x650   :  { %v996_v6 = vsel %vm420_vm3, %v992_v5, -inf }
 0x651   :  { %v993_v29 = vsel %vm420_vm3, %v991_v28, -inf }
 0x65a   :  { %3686 = vrot.lane.b32.xlu1 %v4338_v53, %s4064_s16 }
 0x65e   :  { %1185 = vrot.lane.b32.xlu1 %v4334_v51, %s4065_s17 }
 0x662   :  { %1187 = vrot.lane.b32.xlu1 %v4332_v48, %s4065_s17 }
 0x686   :  { %997 = vmax.xlane.f32.xlu1 %v996_v6 }
 0x6d6   :  { %v632_v7 = vpop.xlane.xlu1 %631 }
 0x6d7   :  { %v634_v8 = vsub.f32 %v626_v61, %v632_v7  ;;  %v629_v9 = vpop.xlane.xlu0 %628 }
 0x6d8   :  { %v633_v11 = vsub.f32 %v625_v62, %v629_v9 }
 0x6d9   :  { %v637_v12 = vmul.f32 1.442695, %v634_v8 }
 0x6da   :  { %v635_v13 = vmul.f32 1.442695, %v633_v11  ;;  %v3687_v53 = vpop.permute.xlu1 %3686 }
 0x6db   :  { %3747 = vpow2.f32 %v637_v12  ;;  %v3689_v14 = vunpack.i.h.bf16 %v3687_v53  ;;  %v3688_v15 = vunpack.i.l.bf16 %v3687_v53 }
 0x6dc   :  { %3749 = vpow2.f32 %v635_v13 }
 0x6dd   :  { %v3542_v51 = vpack.c.bf16 %v3689_v14, %v3688_v15 }
 0x6de   :  { %v1186_v16 = vpop.permute.xlu1 %1185 }
 0x6df   :  { %3544 = vmatprep.subr.msk.bf16.mxu1 %vm4344_vm2, %v3542_v51  ;;  %3369 = vmatprep.mubr.msk.f32.mxu1 %vm330_vm1, %v1186_v16 }
 0x6e0   :  { %3547 = vmatpush3.bf16.xpose.msk.msra.mxu1 %vm4344_vm2, %v3542_v51 }
 0x6e2   :  { %v1188_v17 = vpop.permute.xlu1 %1187 }
 0x6e5   :  { %v3748_v48 = vpop.eup %3747 }
 0x6e6   :  { %v642_v18 = vsel %vm420_vm3, %v3748_v48, 0.0  ;;  %v3750_v19 = vpop.eup %3749 }
 0x6e7   :  { %3370 = vmatmul.mubr.msk.f32.vlgmr.msra.gmra.mrb[8].mxu1 %vm330_vm1, %v1188_v17  ;;  %643 = vadd.xlane.f32.xlu0 %v642_v18  ;;  %v639_v20 = vsel %vm420_vm3, %v3750_v19, 0.0 }
 0x6eb   :  { %640 = vadd.xlane.f32.xlu0 %v639_v20 }
 0x701   :  { %3681 = vrot.lane.b32.xlu0 %v4375_v10, %s4066_s20 }
 0x713   :  { %v998_v24 = vpop.xlane.xlu1 %997 }
 0x714   :  { %v1000_v25 = vsub.f32 %v992_v5, %v998_v24  ;;  %v320_v5 = vld [vmem:[#allocation8] sm:$0xff] }
 0x716   :  { %v1003_v26 = vmul.f32 1.442695, %v1000_v25 }
 0x718   :  { %3751 = vpow2.f32 %v1003_v26 }
 0x720   :  { %994 = vmax.xlane.f32.xlu0 %v993_v29  ;;  %v163_v29 = vld [vmem:[#allocation5] sm:$0xff] }
 0x722   :  { %v4427_v30 = vpop.eup %3751 }
 0x723   :  { %v1008_v31 = vsel %vm420_vm3, %v4427_v30, 0.0 }
 0x724   :  { %1009 = vadd.xlane.f32.xlu0 %v1008_v31  ;;  %v1480_v31 = vsel %vm169_vm0, %v163_v29, 0.0 }
 0x774   :  { %v644_v34 = vpop.xlane.xlu0 %643 }
 0x775   :  { %3753 = vrcp.f32 %v644_v34 }
 0x778   :  { %v641_v35 = vpop.xlane.xlu0 %640 }
 0x779   :  { %3755 = vrcp.f32 %v641_v35 }
 0x77c   :  { %v3682_v36 = vpop.permute.xlu0 %3681 }
 0x77d   :  { %v3684_v37 = vunpack.i.h.bf16 %v3682_v36  ;;  %v3683_v38 = vunpack.i.l.bf16 %v3682_v36 }
 0x77f   :  { %v3528_v39 = vpack.c.bf16 %v3684_v37, %v3683_v38  ;;  %v3754_v40 = vpop.eup %3753 }
 0x780   :  { %v648_v46 = vmul.f32 %v3754_v40, %v3748_v48 }
 0x781   :  { %3529 = vmatprep.subr.bf16.mxu0 %v3528_v39 }
 0x782   :  { %3531 = vmatpush3.bf16.msra.mxu0 %v3528_v39 }
 0x783   :  { %v3756_v42 = vpop.eup %3755  ;;  %3336 = vmatprep.subr.mxu0 %v321_v4 }
 0x784   :  { %v646_v45 = vmul.f32 %v3756_v42, %v3750_v19 }
 0x786   :  { %3333 = vmatprep.mubr.msk.f32.mxu0 %vm420_vm3, %v646_v45 }
 0x787   :  { %3334 = vmatmul.mubr.msk.f32.vlgmr.msra.gmra.mrb[2].mxu0 %vm420_vm3, %v648_v46 }
 0x788   :  { %3337 = vmatpush3.msra.mxu0 %v321_v4  ;;  %v1608_v4 = vld [vmem:[#allocation11 + $0x8] sm:$0xff] }
 0x789   :  { %3341 = vmatprep.subr.mxu0 %v320_v5 }
 0x7ad   :  { %v995_v47 = vpop.xlane.xlu0 %994 }
 0x7ae   :  { %v999_v49 = vsub.f32 %v991_v28, %v995_v47 }
 0x7b0   :  { %v1001_v50 = vmul.f32 1.442695, %v999_v49 }
 0x7b1   :  { %v1010_v6 = vpop.xlane.xlu0 %1009 }
 0x7b2   :  { %3757 = vpow2.f32 %v1001_v50 }
 0x7ba   :  { %v3371_v55 = vpop.f32.mrb[8].mxu1 }
 0x7bb   :  { %v1267_v56 = vpop.f32.mrb[9].mxu1  ;;  %v1277_v59 = vmul.f32 0.35355338, %v3371_v55 }
 0x7bc   :  { %v3758_v58 = vpop.eup %3757  ;;  %v1276_v61 = vmul.f32 0.35355338, %v1267_v56 }
 0x7bd   :  { %v1005_v62 = vsel %vm420_vm3, %v3758_v58, 0.0  ;;  %v1279_v2 = vadd.f32 %v1277_v59, %v4357_v60 }
 0x7be   :  { %1006 = vadd.xlane.f32.xlu0 %v1005_v62  ;;  %v1278_v0 = vadd.f32 %v1276_v61, %v4362_v63 }
 0x7bf   :  { %v1283_v3 = vsel %vm420_vm3, %v1279_v2, -inf }
 0x7c0   :  { %v1280_v1 = vsel %vm420_vm3, %v1278_v0, -inf }
 0x7c1   :  { %1281 = vmax.xlane.f32.xlu1 %v1280_v1  ;;  %v323_v1 = vld [vmem:[#allocation8 + $0x18] sm:$0xff] }
 0x7c5   :  { %1284 = vmax.xlane.f32.xlu1 %v1283_v3  ;;  %v1607_v3 = vld [vmem:[#allocation11] sm:$0xff] }
 0x7d4   :  { %3691 = vrot.lane.b32.xlu0 %v4375_v10, %s4067_s19 }
 0x7f3   :  { %1481 = vadd.xlane.f32.xlu0 %v1480_v31 }
 0x84b   :  { %v1007_v8 = vpop.xlane.xlu0 %1006 }
 0x84c   :  { %3759 = vrcp.f32 %v1007_v8 }
 0x84e   :  { %v1282_v7 = vpop.xlane.xlu1 %1281 }
 0x84f   :  { %v1286_v9 = vsub.f32 %v1278_v0, %v1282_v7  ;;  %v3692_v14 = vpop.permute.xlu0 %3691  ;;  %v1519_v7 = vld [vmem:[#allocation10 + $0x8] sm:$0xff] }
 0x850   :  { %v3694_v15 = vunpack.i.h.bf16 %v3692_v14  ;;  %v3693_v51 = vunpack.i.l.bf16 %v3692_v14 }
 0x851   :  { %v1288_v13 = vmul.f32 1.442695, %v1286_v9 }
 0x852   :  { %v1285_v11 = vpop.xlane.xlu1 %1284  ;;  %v3538_v17 = vpack.c.bf16 %v3694_v15, %v3693_v51  ;;  %v1508_v15 = vsub.s32 4, %v4297_v21 }
 0x853   :  { %v1287_v12 = vsub.f32 %v1279_v2, %v1285_v11 }
 0x855   :  { %v1290_v53 = vmul.f32 1.442695, %v1287_v12 }
 0x856   :  { %v3760_v18 = vpop.eup %3759 }
 0x857   :  { %3761 = vpow2.f32 %v1290_v53  ;;  %v1012_v26 = vmul.f32 %v3760_v18, %v3758_v58 }
 0x858   :  { %3763 = vpow2.f32 %v1288_v13 }
 0x859   :  { %3765 = vrcp.f32 %v1010_v6  ;;  %v1518_v6 = vld [vmem:[#allocation10] sm:$0xff] }
 0x85a   :  { %v3335_v16 = vpop.f32.mrb[2].mxu0  ;;  %v3552_v8 = vpack.c.bf16 %v1519_v7, %v1518_v6 }
 0x85b   :  { %v727_v48 = vpop.f32.mrb[3].mxu0 }
 0x85c   :  { %3338 = vmatprep.mubr.msk.f32.mxu0 %vm330_vm1, %v727_v48  ;;  %3553 = vmatprep.subr.bf16.mxu1 %v3552_v8  ;;  %v1509_v48 = vrot.slane %v4313_v32, %v1508_v15 }
 0x85d   :  { %3339 = vmatmul.mubr.msk.f32.vlgmr.msra.gmra.mrb[4].mxu0 %vm330_vm1, %v3335_v16  ;;  %3555 = vmatpush3.bf16.msra.mxu1 %v3552_v8 }
 0x85e   :  { %3342 = vmatpush3.msra.mxu0 %v320_v5  ;;  %3343 = vmatprep.mubr.msk.f32.mxu0 %vm330_vm1, %v4402_v54  ;;  %v322_v54 = vld [vmem:[#allocation8 + $0x10] sm:$0xff]  ;;  %v3560_v5 = vpack.c.bf16 %v1608_v4, %v1607_v3 }
 0x85f   :  { %3539 = vmatprep.subr.bf16.mxu0 %v3538_v17 }
 0x861   :  { %v3762_v19 = vpop.eup %3761 }
 0x862   :  { %v1295_v20 = vsel %vm420_vm3, %v3762_v19, 0.0  ;;  %v3764_v24 = vpop.eup %3763 }
 0x863   :  { %1296 = vadd.xlane.f32.xlu1 %v1295_v20  ;;  %v3766_v25 = vpop.eup %3765  ;;  %v1292_v27 = vsel %vm420_vm3, %v3764_v24, 0.0 }
 0x864   :  { %v1014_v28 = vmul.f32 %v3766_v25, %v4427_v30  ;;  %v1610_v25 = vld [vmem:[#allocation11 + $0x18] sm:$0xff] }
 0x865   :  { %3344 = vmatmul.mubr.msk.f32.vlgmr.msra.gmra.mrb[4].mxu0 %vm330_vm1, %v4400_v52  ;;  %v164_v52 = vld [vmem:[#allocation5 + $0x8] sm:$0xff] }
 0x866   :  { %3541 = vmatpush3.bf16.msra.mxu0 %v3538_v17  ;;  %3357 = vmatprep.mubr.msk.f32.mxu0 %vm420_vm3, %v1012_v26  ;;  %v1483_v34 = vsel %vm169_vm0, %v164_v52, 0.0  ;;  %v1514_v17 = vsub.s32 5, %v4297_v21 }
 0x867   :  { %1293 = vadd.xlane.f32.xlu1 %v1292_v27  ;;  %3360 = vmatprep.subr.mxu0 %v322_v54 }
 0x868   :  { %v1515_v20 = vrot.slane %v4313_v32, %v1514_v17  ;;  %v1520_v32 = vld [vmem:[#allocation10 + $0x10] sm:$0xff] }
 0x869   :  { %3358 = vmatmul.mubr.msk.f32.vlgmr.msra.gmra.mrb[6].mxu0 %vm420_vm3, %v1014_v28 }
 0x86a   :  { %3361 = vmatpush3.msra.mxu0 %v322_v54 }
 0x878   :  { %3696 = vrot.lane.b32.xlu1 %v4375_v10, %s4068_s21 }
 0x880   :  { %v1482_v40 = vpop.xlane.xlu0 %1481 }
 0x881   :  { %v1486_v10 = vmul.f32 0.03125, %v1482_v40 }
 0x883   :  { %v1488_v42 = vsub.f32 %v163_v29, %v1486_v10 }
 0x885   :  { %v1490_v45 = vmul.f32 %v1488_v42, %v1488_v42 }
 0x887   :  { %v1492_v46 = vsel %vm169_vm0, %v1490_v45, 0.0 }
 0x888   :  { %1493 = vadd.xlane.f32.xlu0 %v1492_v46 }
 0x89c   :  { %1484 = vadd.xlane.f32.xlu1 %v1483_v34  ;;  %v1521_v34 = vld [vmem:[#allocation10 + $0x18] sm:$0xff] }
 0x8f0   :  { %v1297_v35 = vpop.xlane.xlu1 %1296 }
 0x8f4   :  { %v1294_v36 = vpop.xlane.xlu1 %1293 }
 0x8f5   :  { %3767 = vrcp.f32 %v1294_v36  ;;  %v1475_v36 = vrot.slane %v4302_v22, %v205_v33 }
 0x8f6   :  { %3769 = vrcp.f32 %v1297_v35  ;;  %v3556_v35 = vpack.c.bf16 %v1521_v34, %v1520_v32 }
 0x8f8   :  { %v3697_v30 = vpop.permute.xlu1 %3696  ;;  %3557 = vmatprep.subr.bf16.mxu1 %v3556_v35 }
 0x8f9   :  { %v3699_v37 = vunpack.i.h.bf16 %v3697_v30  ;;  %v3698_v38 = vunpack.i.l.bf16 %v3697_v30  ;;  %3559 = vmatpush3.bf16.msra.mxu1 %v3556_v35 }
 0x8fb   :  { %v3548_v39 = vpack.c.bf16 %v3699_v37, %v3698_v38 }
 0x8fd   :  { %3549 = vmatprep.subr.bf16.mxu0 %v3548_v39 }
 0x8ff   :  { %v3768_v58 = vpop.eup %3767 }
 0x900   :  { %v3770_v62 = vpop.eup %3769  ;;  %v1299_v0 = vmul.f32 %v3768_v58, %v3764_v24  ;;  %v1609_v24 = vld [vmem:[#allocation11 + $0x10] sm:$0xff]  ;;  %v1525_v58 = vrot.slane %v4302_v22, %v1508_v15 }
 0x901   :  { %v1301_v2 = vmul.f32 %v3770_v62, %v3762_v19  ;;  %v3564_v29 = vpack.c.bf16 %v1610_v25, %v1609_v24 }
 0x915   :  { %v1494_v9 = vpop.xlane.xlu0 %1493 }
 0x916   :  { %v1498_v11 = vmul.f32 0.03125, %v1494_v9 }
 0x918   :  { %v1500_v12 = vadd.f32 1e-05, %v1498_v11 }
 0x91a   :  { %3771 = vrsqrt.f32 %v1500_v12 }
 0x924   :  { %v3772_v51 = vpop.eup %3771 }
 0x925   :  { %v1504_v16 = vmul.f32 %v3772_v51, %v1488_v42  ;;  %v1695_v42 = vrot.slane %v4302_v22, %v1514_v17 }
 0x927   :  { %v1510_v19 = vmul.f32 %v1509_v48, %v1504_v16 }
 0x929   :  { %v1485_v47 = vpop.xlane.xlu1 %1484  ;;  %v1516_v28 = vadd.f32 %v1515_v20, %v1510_v19 }
 0x92a   :  { %v1487_v49 = vmul.f32 0.03125, %v1485_v47 }
 0x92c   :  { %v1489_v50 = vsub.f32 %v164_v52, %v1487_v49 }
 0x92e   :  { %v1491_v55 = vmul.f32 %v1489_v50, %v1489_v50 }
 0x930   :  { %v1495_v56 = vsel %vm169_vm0, %v1491_v55, 0.0 }
 0x931   :  { %1496 = vadd.xlane.f32.xlu0 %v1495_v56 }
 0x93c   :  { %v3359_v59 = vpop.f32.mrb[6].mxu0 }
 0x93d   :  { %v1093_v61 = vpop.f32.mrb[7].mxu0 }
 0x93e   :  { %3362 = vmatprep.mubr.msk.f32.mxu0 %vm330_vm1, %v1093_v61 }
 0x93f   :  { %3363 = vmatmul.mubr.msk.f32.vlgmr.msra.gmra.mrb[4].mxu0 %vm330_vm1, %v3359_v59 }
 0x940   :  { %3551 = vmatpush3.bf16.msra.mxu0 %v3548_v39  ;;  %3376 = vmatprep.mubr.msk.f32.mxu0 %vm420_vm3, %v1299_v0 }
 0x941   :  { %3379 = vmatprep.subr.mxu0 %v323_v1 }
 0x943   :  { %3377 = vmatmul.mubr.msk.f32.vlgmr.msra.gmra.mrb[8].mxu0 %vm420_vm3, %v1301_v2 }
 0x944   :  { %3380 = vmatpush3.msra.mxu0 %v323_v1 }
 0x945   :  { %3561 = vmatprep.subr.bf16.mxu0 %v3560_v5 }
 0x9be   :  { %v1497_v13 = vpop.xlane.xlu0 %1496 }
 0x9bf   :  { %v1499_v53 = vmul.f32 0.03125, %v1497_v13 }
 0x9c1   :  { %v1501_v14 = vadd.f32 1e-05, %v1499_v53 }
 0x9c3   :  { %3773 = vrsqrt.f32 %v1501_v14 }
 0x9cd   :  { %v3774_v18 = vpop.eup %3773 }
 0x9ce   :  { %v1505_v26 = vmul.f32 %v3774_v18, %v1489_v50 }
 0x9d0   :  { %v1511_v31 = vmul.f32 %v1509_v48, %v1505_v26 }
 0x9d2   :  { %v1517_v52 = vadd.f32 %v1515_v20, %v1511_v31 }
 0xa16   :  { %v3378_v27 = vpop.f32.mrb[8].mxu0 }
 0xa17   :  { %v1380_v54 = vpop.f32.mrb[9].mxu0 }
 0xa18   :  { %3381 = vmatprep.mubr.msk.f32.mxu0 %vm330_vm1, %v1380_v54 }
 0xa19   :  { %3382 = vmatmul.mubr.msk.f32.vlgmr.msra.gmra.mrb[4].mxu0 %vm330_vm1, %v3378_v27 }
 0xa1a   :  { %3563 = vmatpush3.bf16.msra.mxu0 %v3560_v5  ;;  %3403 = vmatprep.mubr.msk.f32.mxu0 %vm169_vm0, %v1516_v28  ;;  %v1700_v28 = vsub.s32 6, %v4297_v21 }
 0xa1b   :  { %3565 = vmatprep.subr.bf16.mxu0 %v3564_v29 }
 0xa1c   :  { %v1701_v54 = vrot.slane %v4302_v22, %v1700_v28 }
 0xa1e   :  { %3567 = vmatpush3.bf16.msra.mxu0 %v3564_v29 }
 0xa21   :  { %3404 = vmatmul.mubr.msk.f32.vlgmr.msra.gmra.mrb[10].mxu0 %vm169_vm0, %v1517_v52 }
 0xaec   :  { %v3383_v30 = vpop.f32.mrb[4].mxu0 }
 0xaed   :  { %v1477_v37 = vadd.f32 %v3383_v30, %v1475_v36  ;;  %v1461_v38 = vpop.f32.mrb[5].mxu0 }
 0xaee   :  { %v1476_v39 = vadd.f32 %v1475_v36, %v1461_v38 }
 0xaef   :  { %v4474_v10 = vadd.f32 %v1477_v37, %v4324_v43 }
 0xaf0   :  { %v4471_v40 = vadd.f32 %v1476_v39, %v4320_v41 }
 0xaf2   :  { %3392 = vmatprep.mubr.msk.f32.mxu1 %vm169_vm0, %v4471_v40 }
 0xaf3   :  { %3393 = vmatmul.mubr.msk.f32.vlgmr.msra.gmra.mrb[10].mxu1 %vm169_vm0, %v4474_v10 }
 0xaf4   :  { %v4481_v45 = vpop.f32.mrb[10].mxu0 }
 0xaf5   :  { %v1697_v33 = vadd.f32 %v4481_v45, %v1695_v42  ;;  %v4484_v46 = vpop.f32.mrb[11].mxu0 }
 0xaf6   :  { %v1696_v41 = vadd.f32 %v1695_v42, %v4484_v46 }
 0xaf8   :  { %v3568_v47 = vpack.c.bf16 %v1697_v33, %v1696_v41  ;;  %v4487_v49 = vpack.i.bf16 %v1697_v33, %v1696_v41 }
 0xafa   :  { %3570 = vmatprep.subr.msk.bf16.mxu1 %vm4344_vm2, %v3568_v47  ;;  %3701 = vrot.lane.b32.xlu0 %v4487_v49, %s4061_s4 }
 0xafb   :  { %3573 = vmatpush3.bf16.xpose.msk.msra.mxu1 %vm4344_vm2, %v3568_v47 }
 0xb6c   :  { %v3702_v43 = vpop.permute.xlu0 %3701 }
 0xb6d   :  { %v3704_v50 = vunpack.i.h.bf16 %v3702_v43  ;;  %v3703_v55 = vunpack.i.l.bf16 %v3702_v43 }
 0xb6f   :  { %v3578_v56 = vpack.c.bf16 %v3704_v50, %v3703_v55 }
 0xb71   :  { %3580 = vmatprep.subr.msk.bf16.mxu1 %vm4344_vm2, %v3578_v56 }
 0xbc6   :  { %v3394_v59 = vpop.f32.mrb[10].mxu1 }
 0xbc7   :  { %v4498_v61 = vadd.f32 %v3394_v59, %v1525_v58  ;;  %v1598_v62 = vpop.f32.mrb[11].mxu1 }
 0xbc8   :  { %v4500_v0 = vadd.f32 %v1598_v62, %v1525_v58 }
 0xbc9   :  { %1916 = vrot.lane.b32.xlu0 %v4498_v61, %s4061_s4 }
 0xbca   :  { %1914 = vrot.lane.b32.xlu1 %v4500_v0, %s4061_s4  ;;  %3410 = vmatprep.mubr.msk.f32.mxu1 %vm330_vm1, %v4500_v0 }
 0xbcb   :  { %3411 = vmatmul.mubr.msk.f32.vlgmr.msra.gmra.mrb[12].mxu1 %vm330_vm1, %v4498_v61 }
 0xbcc   :  { %3583 = vmatpush3.bf16.xpose.msk.msra.mxu1 %vm4344_vm2, %v3578_v56 }
 0xbcd   :  { %2280 = vrot.lane.b32.xlu0 %v4500_v0, %s4062_s13 }
 0xbce   :  { %3706 = vrot.lane.b32.xlu1 %v4487_v49, %s4062_s13 }
 0xbd2   :  { %2282 = vrot.lane.b32.xlu1 %v4498_v61, %s4062_s13 }
 0xc3b   :  { %v1917_v1 = vpop.permute.xlu0 %1916 }
 0xc3c   :  { %v1915_v2 = vpop.permute.xlu1 %1914 }
 0xc3d   :  { %3424 = vmatprep.mubr.msk.f32.mxu1 %vm330_vm1, %v1915_v2 }
 0xc3e   :  { %3425 = vmatmul.mubr.msk.f32.vlgmr.msra.gmra.mrb[14].mxu1 %vm330_vm1, %v1917_v1 }
 0xc3f   :  { %v2281_v3 = vpop.permute.xlu0 %2280 }
 0xc40   :  { %v3707_v4 = vpop.permute.xlu1 %3706  ;;  %3448 = vmatprep.mubr.msk.f32.mxu1 %vm330_vm1, %v2281_v3 }
 0xc41   :  { %v3709_v5 = vunpack.i.h.bf16 %v3707_v4  ;;  %v3708_v6 = vunpack.i.l.bf16 %v3707_v4 }
 0xc43   :  { %v3588_v7 = vpack.c.bf16 %v3709_v5, %v3708_v6 }
 0xc44   :  { %v2283_v8 = vpop.permute.xlu1 %2282 }
 0xc45   :  { %3590 = vmatprep.subr.msk.bf16.mxu1 %vm4344_vm2, %v3588_v7 }
 0xc46   :  { %3593 = vmatpush3.bf16.xpose.msk.msra.mxu1 %vm4344_vm2, %v3588_v7 }
 0xc4d   :  { %3449 = vmatmul.mubr.msk.f32.vlgmr.msra.gmra.mrb[16].mxu1 %vm330_vm1, %v2283_v8 }
 0xc9e   :  { %v3412_v9 = vpop.f32.mrb[12].mxu1 }
 0xc9f   :  { %v1800_v11 = vmul.f32 0.35355338, %v3412_v9  ;;  %v1790_v12 = vpop.f32.mrb[13].mxu1 }
 0xca0   :  { %v1799_v13 = vmul.f32 0.35355338, %v1790_v12 }
 0xca1   :  { %v1802_v53 = vadd.f32 %v1800_v11, %v4357_v60 }
 0xca2   :  { %v1801_v14 = vadd.f32 %v1799_v13, %v4362_v63 }
 0xca3   :  { %v1806_v15 = vsel %vm420_vm3, %v1802_v53, -inf }
 0xca4   :  { %1807 = vmax.xlane.f32.xlu1 %v1806_v15  ;;  %v1803_v51 = vsel %vm420_vm3, %v1801_v14, -inf }
 0xca5   :  { %1804 = vmax.xlane.f32.xlu0 %v1803_v51 }
 0xd11   :  { %v3426_v16 = vpop.f32.mrb[14].mxu1 }
 0xd12   :  { %v1996_v48 = vpop.f32.mrb[15].mxu1  ;;  %v2006_v17 = vmul.f32 0.35355338, %v3426_v16 }
 0xd13   :  { %v2005_v18 = vmul.f32 0.35355338, %v1996_v48 }
 0xd14   :  { %v2008_v24 = vadd.f32 %v2006_v17, %v4357_v60 }
 0xd15   :  { %v2007_v19 = vadd.f32 %v2005_v18, %v4362_v63 }
 0xd16   :  { %v2012_v25 = vsel %vm420_vm3, %v2008_v24, -inf }
 0xd17   :  { %v2009_v20 = vsel %vm420_vm3, %v2007_v19, -inf }
 0xd18   :  { %2010 = vmax.xlane.f32.xlu0 %v2009_v20 }
 0xd1c   :  { %2013 = vmax.xlane.f32.xlu0 %v2012_v25 }
 0xd20   :  { %v3450_v26 = vpop.f32.mrb[16].mxu1 }
 0xd21   :  { %v2362_v27 = vpop.f32.mrb[17].mxu1  ;;  %v2372_v5 = vmul.f32 0.35355338, %v3450_v26 }
 0xd22   :  { %v2371_v1 = vmul.f32 0.35355338, %v2362_v27 }
 0xd23   :  { %v2374_v6 = vadd.f32 %v2372_v5, %v4357_v60 }
 0xd25   :  { %v2378_v7 = vsel %vm420_vm3, %v2374_v6, -inf }
 0xd31   :  { %v1808_v29 = vpop.xlane.xlu1 %1807 }
 0xd32   :  { %v1810_v31 = vsub.f32 %v1802_v53, %v1808_v29  ;;  %v1805_v52 = vpop.xlane.xlu0 %1804  ;;  %1703 = vrot.lane.b32.xlu0 %v1701_v54, %s4057_s15 }
 0xd33   :  { %v1809_v32 = vsub.f32 %v1801_v14, %v1805_v52 }
 0xd34   :  { %v1813_v34 = vmul.f32 1.442695, %v1810_v31 }
 0xd35   :  { %v1811_v35 = vmul.f32 1.442695, %v1809_v32 }
 0xd36   :  { %3775 = vpow2.f32 %v1813_v34 }
 0xd37   :  { %3777 = vpow2.f32 %v1811_v35 }
 0xd40   :  { %v4539_v36 = vpop.eup %3775 }
 0xd41   :  { %v1818_v30 = vsel %vm420_vm3, %v4539_v36, 0.0  ;;  %v3778_v37 = vpop.eup %3777 }
 0xd42   :  { %1819 = vadd.xlane.f32.xlu1 %v1818_v30  ;;  %v1815_v38 = vsel %vm420_vm3, %v3778_v37, 0.0 }
 0xd46   :  { %1816 = vadd.xlane.f32.xlu1 %v1815_v38  ;;  %v1709_v38 = vld [vmem:[#allocation13 + $0x8] sm:$0xff] }
 0xda5   :  { %v2011_v22 = vpop.xlane.xlu0 %2010 }
 0xda6   :  { %v2015_v39 = vsub.f32 %v2007_v19, %v2011_v22  ;;  %v1708_v22 = vld [vmem:[#allocation13] sm:$0xff] }
 0xda8   :  { %v2017_v41 = vmul.f32 1.442695, %v2015_v39 }
 0xda9   :  { %v2014_v42 = vpop.xlane.xlu0 %2013 }
 0xdaa   :  { %v2016_v33 = vsub.f32 %v2008_v24, %v2014_v42 }
 0xdac   :  { %v2019_v47 = vmul.f32 1.442695, %v2016_v33 }
 0xdad   :  { %v1704_v43 = vpop.permute.xlu0 %1703 }
 0xdae   :  { %3779 = vpow2.f32 %v2019_v47  ;;  %v1706_v50 = vadd.f32 %v1704_v43, %v4484_v46  ;;  %v1707_v55 = vadd.f32 %v4481_v45, %v1704_v43 }
 0xdaf   :  { %3781 = vpow2.f32 %v2017_v41 }
 0xdb0   :  { %v4546_v56 = vpack.i.bf16 %v1707_v55, %v1706_v50 }
 0xdb2   :  { %3716 = vrot.lane.b32.xlu0 %v4546_v56, %s4060_s0 }
 0xdb6   :  { %3721 = vrot.lane.b32.xlu0 %v4487_v49, %s4065_s17  ;;  %v2373_v49 = vadd.f32 %v2371_v1, %v4362_v63 }
 0xdb8   :  { %v3780_v58 = vpop.eup %3779  ;;  %v2375_v3 = vsel %vm420_vm3, %v2373_v49, -inf }
 0xdb9   :  { %v3782_v59 = vpop.eup %3781  ;;  %v2024_v62 = vsel %vm420_vm3, %v3780_v58, 0.0 }
 0xdba   :  { %2025 = vadd.xlane.f32.xlu1 %v2024_v62  ;;  %2567 = vrot.lane.b32.xlu0 %v4500_v0, %s4065_s17  ;;  %v2021_v46 = vsel %vm420_vm3, %v3782_v59, 0.0 }
 0xdbe   :  { %2022 = vadd.xlane.f32.xlu1 %v2021_v46  ;;  %v3811_v46 = vld [vmem:[%s4651_s10 + $0x8] sm:$0xff] }
 0xdcf   :  { %v1820_v45 = vpop.xlane.xlu1 %1819  ;;  %3711 = vrot.lane.b32.xlu1 %v4546_v56, %s4058_s24 }
 0xdd3   :  { %v1817_v2 = vpop.xlane.xlu1 %1816  ;;  %2569 = vrot.lane.b32.xlu1 %v4498_v61, %s4065_s17 }
 0xdd4   :  { %3783 = vrcp.f32 %v1817_v2 }
 0xdd5   :  { %3785 = vrcp.f32 %v1820_v45 }
 0xdd9   :  { %2376 = vmax.xlane.f32.xlu0 %v2375_v3 }
 0xdde   :  { %v3784_v4 = vpop.eup %3783 }
 0xddf   :  { %v1822_v0 = vmul.f32 %v3784_v4, %v3778_v37  ;;  %v3786_v18 = vpop.eup %3785 }
 0xde0   :  { %v1824_v24 = vmul.f32 %v3786_v18, %v4539_v36 }
 0xde1   :  { %3417 = vmatprep.mubr.msk.f32.mxu0 %vm420_vm3, %v1822_v0 }
 0xdf7   :  { %2379 = vmax.xlane.f32.xlu1 %v2378_v7 }
 0xe24   :  { %v3717_v8 = vpop.permute.xlu0 %3716 }
 0xe25   :  { %v3719_v15 = vunpack.i.h.bf16 %v3717_v8  ;;  %v3718_v51 = vunpack.i.l.bf16 %v3717_v8  ;;  %v1710_v8 = vld [vmem:[#allocation13 + $0x10] sm:$0xff] }
 0xe27   :  { %v3584_v20 = vpack.c.bf16 %v3719_v15, %v3718_v51 }
 0xe28   :  { %v3722_v9 = vpop.permute.xlu0 %3721 }
 0xe29   :  { %v3724_v11 = vunpack.i.h.bf16 %v3722_v9  ;;  %v3723_v61 = vunpack.i.l.bf16 %v3722_v9 }
 0xe2b   :  { %v3598_v12 = vpack.c.bf16 %v3724_v11, %v3723_v61 }
 0xe2c   :  { %v2568_v13 = vpop.permute.xlu0 %2567 }
 0xe2d   :  { %3600 = vmatprep.subr.msk.bf16.mxu1 %vm4344_vm2, %v3598_v12  ;;  %3467 = vmatprep.mubr.msk.f32.mxu1 %vm330_vm1, %v2568_v13 }
 0xe2e   :  { %3603 = vmatpush3.bf16.xpose.msk.msra.mxu1 %vm4344_vm2, %v3598_v12 }
 0xe47   :  { %v2026_v53 = vpop.xlane.xlu1 %2025 }
 0xe4b   :  { %v2023_v60 = vpop.xlane.xlu1 %2022 }
 0xe4c   :  { %3787 = vrcp.f32 %v2023_v60 }
 0xe4d   :  { %3789 = vrcp.f32 %v2026_v53 }
 0xe4f   :  { %v3712_v14 = vpop.permute.xlu1 %3711 }
 0xe50   :  { %v3714_v16 = vunpack.i.h.bf16 %v3712_v14  ;;  %v3713_v48 = vunpack.i.l.bf16 %v3712_v14 }
 0xe52   :  { %v3574_v17 = vpack.c.bf16 %v3714_v16, %v3713_v48 }
 0xe53   :  { %v2570_v19 = vpop.permute.xlu1 %2569 }
 0xe54   :  { %3575 = vmatprep.subr.bf16.mxu0 %v3574_v17  ;;  %3468 = vmatmul.mubr.msk.f32.vlgmr.msra.gmra.mrb[18].mxu1 %vm330_vm1, %v2570_v19 }
 0xe55   :  { %3577 = vmatpush3.bf16.msra.mxu0 %v3574_v17 }
 0xe56   :  { %v3788_v57 = vpop.eup %3787  ;;  %3585 = vmatprep.subr.bf16.mxu0 %v3584_v20 }
 0xe57   :  { %v3790_v25 = vpop.eup %3789  ;;  %v2028_v26 = vmul.f32 %v3788_v57, %v3782_v59 }
 0xe58   :  { %3418 = vmatmul.mubr.msk.f32.vlgmr.msra.gmra.mrb[12].mxu0 %vm420_vm3, %v1824_v24  ;;  %v2030_v27 = vmul.f32 %v3790_v25, %v3780_v58  ;;  %v1711_v25 = vld [vmem:[#allocation13 + $0x18] sm:$0xff] }
 0xe59   :  { %3587 = vmatpush3.bf16.msra.mxu0 %v3584_v20  ;;  %3431 = vmatprep.mubr.msk.f32.mxu0 %vm420_vm3, %v2028_v26 }
 0xe5a   :  { %3434 = vmatprep.subr.mxu0 %v1709_v38 }
 0xe5c   :  { %3432 = vmatmul.mubr.msk.f32.vlgmr.msra.gmra.mrb[14].mxu0 %vm420_vm3, %v2030_v27 }
 0xe5d   :  { %3435 = vmatpush3.msra.mxu0 %v1709_v38 }
 0xe5e   :  { %3439 = vmatprep.subr.mxu0 %v1708_v22 }
 0xe66   :  { %v2377_v54 = vpop.xlane.xlu0 %2376 }
 0xe67   :  { %v2381_v29 = vsub.f32 %v2373_v49, %v2377_v54 }
 0xe69   :  { %v2383_v32 = vmul.f32 1.442695, %v2381_v29 }
 0xe84   :  { %v2380_v31 = vpop.xlane.xlu1 %2379 }
 0xe85   :  { %v2382_v52 = vsub.f32 %v2374_v6, %v2380_v31 }
 0xe87   :  { %v2385_v34 = vmul.f32 1.442695, %v2382_v52  ;;  %v2856_v52 = vsub.s32 7, %v4297_v21 }
 0xe89   :  { %3791 = vpow2.f32 %v2385_v34 }
 0xe8a   :  { %3793 = vpow2.f32 %v2383_v32  ;;  %v3812_v32 = vld [vmem:[%s4650_s9] sm:$0xff] }
 0xe8b   :  { %v2857_v34 = vrot.slane %v3812_v32, %v2856_v52 }
 0xe93   :  { %v3792_v35 = vpop.eup %3791 }
 0xe94   :  { %v2390_v36 = vsel %vm420_vm3, %v3792_v35, 0.0  ;;  %v3794_v30 = vpop.eup %3793 }
 0xe95   :  { %2391 = vadd.xlane.f32.xlu0 %v2390_v36  ;;  %v2387_v37 = vsel %vm420_vm3, %v3794_v30, 0.0 }
 0xe99   :  { %2388 = vadd.xlane.f32.xlu0 %v2387_v37 }
 0xeaf   :  { %3726 = vrot.lane.b32.xlu0 %v4546_v56, %s4063_s14 }
 0xf22   :  { %v2392_v39 = vpop.xlane.xlu0 %2391 }
 0xf26   :  { %v2389_v42 = vpop.xlane.xlu0 %2388 }
 0xf27   :  { %v3469_v33 = vpop.f32.mrb[18].mxu1  ;;  %3795 = vrcp.f32 %v2389_v42 }
 0xf28   :  { %v2649_v41 = vpop.f32.mrb[19].mxu1  ;;  %v2659_v47 = vmul.f32 0.35355338, %v3469_v33  ;;  %3797 = vrcp.f32 %v2392_v39 }
 0xf29   :  { %v2658_v43 = vmul.f32 0.35355338, %v2649_v41 }
 0xf2a   :  { %v3727_v50 = vpop.permute.xlu0 %3726  ;;  %v2661_v45 = vadd.f32 %v3811_v46, %v2659_v47  ;;  %v2901_v46 = vld [vmem:[#allocation14 + $0x8] sm:$0xff] }
 0xf2b   :  { %v3419_v55 = vpop.f32.mrb[12].mxu0  ;;  %v2660_v58 = vadd.f32 %v2658_v43, %v4362_v63  ;;  %v3729_v1 = vunpack.i.h.bf16 %v3727_v50  ;;  %v3728_v2 = vunpack.i.l.bf16 %v3727_v50 }
 0xf2c   :  { %v1905_v59 = vpop.f32.mrb[13].mxu0  ;;  %v2665_v4 = vsel %vm420_vm3, %v2661_v45, -inf }
 0xf2d   :  { %v2662_v62 = vsel %vm420_vm3, %v2660_v58, -inf  ;;  %v3594_v63 = vpack.c.bf16 %v3729_v1, %v3728_v2  ;;  %v2902_v1 = vld [vmem:[#allocation14 + $0x10] sm:$0xff]  ;;  %v2903_v2 = vld [vmem:[#allocation14 + $0x18] sm:$0xff] }
 0xf2e   :  { %2663 = vmax.xlane.f32.xlu1 %v2662_v62 }
 0xf2f   :  { %v3433_v49 = vpop.f32.mrb[14].mxu0 }
 0xf30   :  { %v2109_v3 = vpop.f32.mrb[15].mxu0 }
 0xf31   :  { %3436 = vmatprep.mubr.msk.f32.mxu0 %vm330_vm1, %v2109_v3  ;;  %v3796_v0 = vpop.eup %3795  ;;  %v2991_v3 = vld [vmem:[#allocation16] sm:$0xff] }
 0xf32   :  { %2666 = vmax.xlane.f32.xlu1 %v2665_v4  ;;  %3437 = vmatmul.mubr.msk.f32.vlgmr.msra.gmra.mrb[16].mxu0 %vm330_vm1, %v3433_v49  ;;  %v3798_v5 = vpop.eup %3797  ;;  %v2394_v6 = vmul.f32 %v3796_v0, %v3794_v30  ;;  %v3612_v49 = vpack.c.bf16 %v2903_v2, %v2902_v1  ;;  %v2992_v4 = vld [vmem:[#allocation16 + $0x8] sm:$0xff] }
 0xf33   :  { %3440 = vmatpush3.msra.mxu0 %v1708_v22  ;;  %3441 = vmatprep.mubr.msk.f32.mxu0 %vm330_vm1, %v1905_v59  ;;  %v2396_v7 = vmul.f32 %v3798_v5, %v3792_v35 }
 0xf34   :  { %3595 = vmatprep.subr.bf16.mxu0 %v3594_v63 }
 0xf3a   :  { %3442 = vmatmul.mubr.msk.f32.vlgmr.msra.gmra.mrb[16].mxu0 %vm330_vm1, %v3419_v55 }
 0xf3b   :  { %3597 = vmatpush3.bf16.msra.mxu0 %v3594_v63  ;;  %3455 = vmatprep.mubr.msk.f32.mxu0 %vm420_vm3, %v2394_v6  ;;  %v3616_v63 = vpack.c.bf16 %v2992_v4, %v2991_v3 }
 0xf3c   :  { %3458 = vmatprep.subr.mxu0 %v1710_v8 }
 0xf3e   :  { %3456 = vmatmul.mubr.msk.f32.vlgmr.msra.gmra.mrb[18].mxu0 %vm420_vm3, %v2396_v7 }
 0xf3f   :  { %3459 = vmatpush3.msra.mxu0 %v1710_v8 }
 0xfbb   :  { %v2664_v9 = vpop.xlane.xlu1 %2663 }
 0xfbc   :  { %v2668_v11 = vsub.f32 %v2660_v58, %v2664_v9 }
 0xfbe   :  { %v2670_v13 = vmul.f32 1.442695, %v2668_v11  ;;  %v3813_v11 = vld [vmem:[%s4650_s9 + $0x8] sm:$0xff]  ;;  %s4069_s9 = smov [#allocation17]  }
 0xfbf   :  { %v2667_v61 = vpop.xlane.xlu1 %2666  ;;  %s3089_s3 = sshll.u32 %s4069_s9, 4  ;;  %s3090_s3 = int_to_ptr.vmem [resolvable:$true] %s3089_s3 }
 0xfc0   :  { %v2669_v12 = vsub.f32 %v2661_v45, %v2667_v61  ;;  %v2891_v61 = vrot.slane %v3813_v11, %v1700_v28  ;;  %v2907_v28 = vrot.slane %v3813_v11, %v296_v44  ;;  %s4012_s8 = scalar_lea.vmem %s3090_s3, 256  ;;  %p4017_p3 = scmp.lt.s32.totalorder %s3090_s3, %s3090_s3 }
 0xfc1   :  { %p4013_p2 = scmp.ne.s32.totalorder %s3090_s3, %s4012_s8  ;;  %p4018_p4 = scmp.lt.s32.totalorder %s4012_s8, %s4012_s8 }
 0xfc2   :  { %v2672_v53 = vmul.f32 1.442695, %v2669_v12 }
 0xfc3   :  { %p4019_p5 = por %p4018_p4, %p4017_p3 }
 0xfc4   :  { %3799 = vpow2.f32 %v2672_v53 }
 0xfc5   :  { %3801 = vpow2.f32 %v2670_v13  ;;  %v2897_v13 = vrot.slane %v3813_v11, %v2856_v52  ;;  %p4020_p6 = pnand %p4019_p5, %p4013_p2 }
 0xfce   :  { %v3800_v60 = vpop.eup %3799 }
 0xfcf   :  { %v2677_v14 = vsel %vm420_vm3, %v3800_v60, 0.0  ;;  %v3802_v15 = vpop.eup %3801 }
 0xfd0   :  { %2678 = vadd.xlane.f32.xlu1 %v2677_v14  ;;  %v2674_v51 = vsel %vm420_vm3, %v3802_v15, 0.0 }
 0xfd4   :  { %2675 = vadd.xlane.f32.xlu1 %v2674_v51 }
 0xfe5   :  { %3731 = vrot.lane.b32.xlu1 %v4546_v56, %s4064_s16 }
0x1011   :  { %v3457_v16 = vpop.f32.mrb[18].mxu0 }
0x1012   :  { %v2475_v48 = vpop.f32.mrb[19].mxu0 }
0x1013   :  { %3460 = vmatprep.mubr.msk.f32.mxu0 %vm330_vm1, %v2475_v48 }
0x1014   :  { %3461 = vmatmul.mubr.msk.f32.vlgmr.msra.gmra.mrb[16].mxu0 %vm330_vm1, %v3457_v16 }
0x105d   :  { %v2679_v17 = vpop.xlane.xlu1 %2678 }
0x105e   :  { %3803 = vrcp.f32 %v2679_v17  ;;  %v2993_v17 = vld [vmem:[#allocation16 + $0x10] sm:$0xff] }
0x1061   :  { %v2676_v18 = vpop.xlane.xlu1 %2675 }
0x1062   :  { %3805 = vrcp.f32 %v2676_v18  ;;  %v2994_v18 = vld [vmem:[#allocation16 + $0x18] sm:$0xff] }
0x1065   :  { %v3732_v19 = vpop.permute.xlu1 %3731 }
0x1066   :  { %v3734_v20 = vunpack.i.h.bf16 %v3732_v19  ;;  %v3733_v57 = vunpack.i.l.bf16 %v3732_v19  ;;  %v3620_v19 = vpack.c.bf16 %v2994_v18, %v2993_v17 }
0x1068   :  { %v3604_v24 = vpack.c.bf16 %v3734_v20, %v3733_v57  ;;  %v3804_v26 = vpop.eup %3803 }
0x1069   :  { %v2683_v54 = vmul.f32 %v3804_v26, %v3800_v60 }
0x106a   :  { %3605 = vmatprep.subr.bf16.mxu0 %v3604_v24 }
0x106b   :  { %3607 = vmatpush3.bf16.msra.mxu0 %v3604_v24 }
0x106c   :  { %v3806_v27 = vpop.eup %3805  ;;  %3477 = vmatprep.subr.mxu0 %v1711_v25 }
0x106d   :  { %v2681_v56 = vmul.f32 %v3806_v27, %v3802_v15 }
0x106f   :  { %3474 = vmatprep.mubr.msk.f32.mxu0 %vm420_vm3, %v2681_v56  ;;  %v2998_v56 = vrot.slane %v3813_v11, %v302_v23 }
0x1070   :  { %3475 = vmatmul.mubr.msk.f32.vlgmr.msra.gmra.mrb[20].mxu0 %vm420_vm3, %v2683_v54 }
0x1071   :  { %3478 = vmatpush3.msra.mxu0 %v1711_v25 }
0x1072   :  { %3617 = vmatprep.subr.bf16.mxu0 %v3616_v63 }
0x1143   :  { %v3476_v29 = vpop.f32.mrb[20].mxu0 }
0x1144   :  { %v2762_v31 = vpop.f32.mrb[21].mxu0 }
0x1145   :  { %3479 = vmatprep.mubr.msk.f32.mxu0 %vm330_vm1, %v2762_v31 }
0x1146   :  { %3480 = vmatmul.mubr.msk.f32.vlgmr.msra.gmra.mrb[16].mxu0 %vm330_vm1, %v3476_v29 }
0x1147   :  { %3619 = vmatpush3.bf16.msra.mxu0 %v3616_v63 }
0x1148   :  { %3621 = vmatprep.subr.bf16.mxu0 %v3620_v19 }
0x114b   :  { %3623 = vmatpush3.bf16.msra.mxu0 %v3620_v19 }
0x1219   :  { %v3481_v35 = vpop.f32.mrb[16].mxu0 }
0x121a   :  { %v2859_v36 = vadd.f32 %v3481_v35, %v2857_v34  ;;  %v2843_v30 = vpop.f32.mrb[17].mxu0 }
0x121b   :  { %v2858_v37 = vadd.f32 %v2857_v34, %v2843_v30 }
0x121c   :  { %v2861_v38 = vadd.f32 %v2859_v36, %v4474_v10 }
0x121d   :  { %v2860_v22 = vadd.f32 %v2858_v37, %v4471_v40  ;;  %v2900_v40 = vld [vmem:[#allocation14] sm:$0xff] }
0x121e   :  { %v2865_v39 = vsel %vm169_vm0, %v2861_v38, 0.0  ;;  %v3608_v45 = vpack.c.bf16 %v2901_v46, %v2900_v40 }
0x121f   :  { %2866 = vadd.xlane.f32.xlu1 %v2865_v39  ;;  %v2862_v42 = vsel %vm169_vm0, %v2860_v22, 0.0 }
0x1220   :  { %2863 = vadd.xlane.f32.xlu0 %v2862_v42  ;;  %3609 = vmatprep.subr.bf16.mxu1 %v3608_v45 }
0x1221   :  { %3611 = vmatpush3.bf16.msra.mxu1 %v3608_v45 }
0x1222   :  { %3613 = vmatprep.subr.bf16.mxu1 %v3612_v49 }
0x1225   :  { %3615 = vmatpush3.bf16.msra.mxu1 %v3612_v49 }
0x12ac   :  { %v2867_v33 = vpop.xlane.xlu1 %2866 }
0x12ad   :  { %v2869_v41 = vmul.f32 0.03125, %v2867_v33  ;;  %v2864_v47 = vpop.xlane.xlu0 %2863 }
0x12ae   :  { %v2868_v43 = vmul.f32 0.03125, %v2864_v47 }
0x12af   :  { %v2871_v50 = vsub.f32 %v2861_v38, %v2869_v41 }
0x12b0   :  { %v2870_v55 = vsub.f32 %v2860_v22, %v2868_v43 }
0x12b1   :  { %v2873_v62 = vmul.f32 %v2871_v50, %v2871_v50 }
0x12b2   :  { %v2872_v58 = vmul.f32 %v2870_v55, %v2870_v55 }
0x12b3   :  { %v2877_v10 = vsel %vm169_vm0, %v2873_v62, 0.0 }
0x12b4   :  { %v2874_v59 = vsel %vm169_vm0, %v2872_v58, 0.0 }
0x12b5   :  { %2875 = vadd.xlane.f32.xlu0 %v2874_v59 }
0x12b9   :  { %2878 = vadd.xlane.f32.xlu0 %v2877_v10 }
0x1342   :  { %v2876_v0 = vpop.xlane.xlu0 %2875 }
0x1343   :  { %v2880_v5 = vmul.f32 0.03125, %v2876_v0 }
0x1345   :  { %v2882_v6 = vadd.f32 1e-05, %v2880_v5 }
0x1346   :  { %v2879_v7 = vpop.xlane.xlu0 %2878 }
0x1347   :  { %3807 = vrsqrt.f32 %v2882_v6  ;;  %v2881_v8 = vmul.f32 0.03125, %v2879_v7 }
0x1349   :  { %v2883_v9 = vadd.f32 1e-05, %v2881_v8 }
0x134b   :  { %3809 = vrsqrt.f32 %v2883_v9 }
0x1351   :  { %v3808_v12 = vpop.eup %3807 }
0x1352   :  { %v2886_v53 = vmul.f32 %v3808_v12, %v2870_v55 }
0x1354   :  { %v2892_v60 = vmul.f32 %v2891_v61, %v2886_v53 }
0x1355   :  { %v3810_v14 = vpop.eup %3809 }
0x1356   :  { %v2887_v15 = vmul.f32 %v3810_v14, %v2871_v50  ;;  %v2898_v51 = vadd.f32 %v2897_v13, %v2892_v60 }
0x1358   :  { %v2893_v16 = vmul.f32 %v2891_v61, %v2887_v15  ;;  %3490 = vmatprep.mubr.msk.f32.mxu1 %vm169_vm0, %v2898_v51 }
0x135a   :  { %v2899_v48 = vadd.f32 %v2897_v13, %v2893_v16 }
0x135c   :  { %3491 = vmatmul.mubr.msk.f32.vlgmr.msra.gmra.mrb[20].mxu1 %vm169_vm0, %v2899_v48 }
0x142f   :  { %v3492_v20 = vpop.f32.mrb[20].mxu1 }
0x1430   :  { %v2986_v57 = vadd.f32 %v3492_v20, %v2907_v28  ;;  %v2980_v24 = vpop.f32.mrb[21].mxu1 }
0x1431   :  { %v2981_v25 = vadd.f32 %v2980_v24, %v2907_v28 }
0x1432   :  { %v2990_v27 = vmax.f32 %v2986_v57, 0.0 }
0x1433   :  { %v2989_v26 = vmax.f32 %v2981_v25, 0.0 }
0x1435   :  { %3501 = vmatprep.mubr.msk.f32.mxu0 %vm169_vm0, %v2989_v26 }
0x1436   :  { %3502 = vmatmul.mubr.msk.f32.vlgmr.msra.gmra.mrb[22].mxu0 %vm169_vm0, %v2990_v27 }
0x1509   :  { %v3503_v54 = vpop.f32.mrb[22].mxu0 }
0x150a   :  { %v3077_v29 = vadd.f32 %v3503_v54, %v2998_v56  ;;  %v3071_v31 = vpop.f32.mrb[23].mxu0 }
0x150b   :  { %v3072_v52 = vadd.f32 %v3071_v31, %v2998_v56 }
0x150c   :  { %v3081_v44 = vadd.f32 %v3077_v29, %v2899_v48 }
0x150d   :  { %v3080_v32 = vadd.f32 %v3072_v52, %v2898_v51 }
0x150e   :  { %3083 = vst.msk [vmem:[#allocation17 + $0x8] sm:$0xff] %vm169_vm0, %v3081_v44 }
0x150f   :  { %3082 = vst.msk [vmem:[#allocation17] sm:$0xff] %vm169_vm0, %v3080_v32 }
0x1510   :  { %4023 = shalt.err (!%p4020_p6)
}
0x1511   :  { %s4024_s1 = scalar_lea.hbm %s4652_s11, 256 }
0x1512   :  { %p4025_p7 = scmp.ne.s32.totalorder %s4652_s11, %s4024_s1  ;;  %p4028_p8 = scmp.lt.u32.totalorder %s4024_s1, %s4652_s11 }
0x1514   :  { %p4030_p9 = pnand %p4028_p8, %p4025_p7 }
0x1516   :  { %4033 = shalt.err (!%p4030_p9)
}
0x1517   :  { %3095 = dma.vmem_to_hbm [thread:$0]  %s3090_s3, 256, %s4652_s11, [#allocation4], %s4048_s29, %s4048_s29, %s4049_s30  }
0x1518   :  { %4044 = dma.done.wait [#allocation4], 256  }
0x1519   :  { %4045 = vsyncadd [#allocation4], 4294967040 }
0x151a   :  { %3099 = vsyncpa [#allocation3], 1 }
0x151b   :  { %3100 = vsyncpa [#allocation6], 1 }
0x151c   :  { %3101 = vsyncpa [#allocation9], 1 }
0x151d   :  { %3102 = vsyncpa [#allocation12], 1 }
0x151e   :  { %3103 = vsyncpa [#allocation15], 1 }
0x151f   :  { %3104 = vsyncpa [#allocation4], 1 }

</bundles_post_ra>
